<compile_context>
chip_gen: v5e
topology: v5e:2x2
jax: 0.10.0
libtpu: 0.0.40
codegen_flags: <defaults>
</compile_context>

<pallas_src>
import functools

import jax
import jax.numpy as jnp
from jax.experimental import pallas as pl
from jax.experimental.pallas import tpu as pltpu

HIDDEN = 128
LANE = 128
SUBLANE = 8


def _round_up(n, m):
    return ((n + m - 1) // m) * m


def _mlp_kernel(x_ref, w1_ref, b1_ref, w2_ref, b2_ref, w3_ref, b3_ref, o_ref, *,
                out_dim):
    """One batch tile of Linear->ReLU->Linear->ReLU->Linear."""
    x = x_ref[...]

    # Layer 1: bf16 MXU operands, f32 accumulate; bias + ReLU in f32.
    # TODO(synk): with K=in_dim (e.g. 4) this MXU pass is nearly empty and could be
    # 4 broadcast-FMAs on the VPU instead -- marginal, kernel is overhead/DMA bound.
    h1 = jnp.dot(x.astype(jnp.bfloat16), w1_ref[...],
                 preferred_element_type=jnp.float32) + b1_ref[...]
    h1 = jnp.maximum(h1, 0.0)

    # Layer 2
    h2 = jnp.dot(h1.astype(jnp.bfloat16), w2_ref[...],
                 preferred_element_type=jnp.float32) + b2_ref[...]
    h2 = jnp.maximum(h2, 0.0)

    # Layer 3: computed at 128 MXU lanes (w3 zero-padded), but only the real out_dim
    # columns are written back -> ~LANE/out_dim less HBM writeback.
    q = jnp.dot(h2.astype(jnp.bfloat16), w3_ref[...],
                preferred_element_type=jnp.float32) + b3_ref[...]
    o_ref[...] = q[:, :out_dim].astype(o_ref.dtype)


def prepare_params(params):
    """One-time conversion of PyTorch-convention params to kernel layout.

    - transpose W (out, in) -> (in, out) so the kernel computes x @ W + b on the MXU
    - pad the final layer's weight/bias out-features up to 128 lanes (MXU-friendly)
    - weights cast to bf16 (MXU-native, halves weight DMA); biases kept f32, (1, out)
    Call this once at param load/update time, NOT inside the forward path.
    """
    w1, b1 = params["w1"], params["b1"]   # (128, in_dim), (128,)
    w2, b2 = params["w2"], params["b2"]   # (128, 128),    (128,)
    w3, b3 = params["w3"], params["b3"]   # (out_dim, 128),(out_dim,)
    out_dim = w3.shape[0]
    out_pad = _round_up(out_dim, LANE)

    w3t = jnp.zeros((HIDDEN, out_pad), jnp.float32).at[:, :out_dim].set(w3.T)
    b3r = jnp.zeros((1, out_pad), jnp.float32).at[:, :out_dim].set(b3)

    return {
        "w1t": w1.T.astype(jnp.bfloat16),            # (in_dim, 128)
        "b1r": b1[None, :].astype(jnp.float32),      # (1, 128)
        "w2t": w2.T.astype(jnp.bfloat16),            # (128, 128)
        "b2r": b2[None, :].astype(jnp.float32),      # (1, 128)
        "w3t": w3t.astype(jnp.bfloat16),             # (128, out_pad)
        "b3r": b3r,                                  # (1, out_pad) f32
        "out_dim": out_dim,
    }


def _forward_jnp(x, prep):
    """Plain-XLA path with the same bf16-operand / f32-accumulate semantics."""
    mm = lambda a, w: jnp.dot(a.astype(jnp.bfloat16), w,
                              preferred_element_type=jnp.float32)
    h1 = jnp.maximum(mm(x, prep["w1t"]) + prep["b1r"], 0.0)
    h2 = jnp.maximum(mm(h1, prep["w2t"]) + prep["b2r"], 0.0)
    q = mm(h2, prep["w3t"]) + prep["b3r"]
    return q[:, :prep["out_dim"]]


def net_forward(x, prep, *, tile_b=2048, small_batch_threshold=128):
    """x: (B, in_dim) float32.  prep: output of prepare_params()."""
    B, in_dim = x.shape
    out_dim = prep["out_dim"]

    # Tiny (action-selection) batches: the kernel can never win -- it is pure launch +
    # DMA-setup overhead at this size.  Use the fused XLA path (same semantics).
    if B <= small_batch_threshold:
        return _forward_jnp(x, prep)

    w1t, b1r = prep["w1t"], prep["b1r"]
    w2t, b2r = prep["w2t"], prep["b2r"]
    w3t, b3r = prep["w3t"], prep["b3r"]
    out_pad = w3t.shape[1]

    # Batch tiling: pad B only to a sublane multiple (<= 7 wasted rows).  Partial
    # trailing grid blocks are handled/masked by Pallas (grid uses cdiv), so there is
    # no 2x padding blowup for batch sizes just above a tile multiple.
    B_pad = _round_up(B, SUBLANE)
    tb = max(SUBLANE, _round_up(min(tile_b, B_pad), SUBLANE))
    # v7x has 2 TensorCores: guarantee >= 2 steps on the "parallel" axis for
    # training-size batches so both cores get work.
    if B_pad >= 512 and pl.cdiv(B_pad, tb) < 2:
        tb = _round_up(pl.cdiv(B_pad, 2), SUBLANE)
    grid = (pl.cdiv(B_pad, tb),)

    if B_pad != B:
        x = jnp.pad(x, ((0, B_pad - B), (0, 0)))

    # Weights/biases: constant index_map -> VMEM-resident across grid steps.
    # TODO(synk): pipeline_mode=pl.Buffered(1) would single-buffer these (~65 KiB VMEM
    # back); skipped as negligible here.
    const2d = lambda shape: pl.BlockSpec(shape, lambda i: (0, 0))

    # VMEM budget from *lane-padded* buffer layouts: double-buffered x/out tiles plus
    # (double-buffered) weights/biases, 2x headroom, clamped to [16, 48] MiB (< v7x's
    # 64 MiB physical VMEM).
    in_vmem = _round_up(in_dim, LANE)
    out_vmem = _round_up(out_dim, LANE)
    tile_bytes = 2 * tb * (in_vmem + out_vmem) * 4                       # f32 x/out
    weight_bytes = 2 * 2 * (_round_up(in_dim, 16) * HIDDEN
                            + HIDDEN * HIDDEN + HIDDEN * out_pad)        # bf16 x2 bufs
    bias_bytes = 2 * 4 * SUBLANE * (HIDDEN + HIDDEN + out_pad)           # f32 x2 bufs
    vmem_limit = int(min(48 << 20,
                         max(16 << 20,
                             2 * (tile_bytes + weight_bytes + bias_bytes))))

    q = pl.pallas_call(
        functools.partial(_mlp_kernel, out_dim=out_dim),
        out_shape=jax.ShapeDtypeStruct((B_pad, out_dim), jnp.float32),
        grid=grid,
        in_specs=[
            pl.BlockSpec((tb, in_dim), lambda i: (i, 0)),        # x: tiled over batch
            const2d(w1t.shape), const2d(b1r.shape),              # resident weights
            const2d(w2t.shape), const2d(b2r.shape),
            const2d(w3t.shape), const2d(b3r.shape),
        ],
        out_specs=pl.BlockSpec((tb, out_dim), lambda i: (i, 0)), # unpadded out_dim
        compiler_params=pltpu.CompilerParams(
            dimension_semantics=("parallel",),   # shard batch tiles across TCs on v7x
            vmem_limit_bytes=vmem_limit,
        ),
    )(x, w1t, b1r, w2t, b2r, w3t, b3r)

    return q[:B] if B_pad != B else q


def init_params(key, in_dim, out_dim, hidden=HIDDEN):
    """Deterministic init mimicking nn.Linear's default U(-1/sqrt(fan_in), +)."""
    ks = jax.random.split(key, 6)

    def lin(kw, kb, fan_in, fan_out):
        bound = 1.0 / jnp.sqrt(jnp.float32(fan_in))
        w = jax.random.uniform(kw, (fan_out, fan_in), jnp.float32, -bound, bound)
        b = jax.random.uniform(kb, (fan_out,), jnp.float32, -bound, bound)
        return w, b

    w1, b1 = lin(ks[0], ks[1], in_dim, hidden)
    w2, b2 = lin(ks[2], ks[3], hidden, hidden)
    w3, b3 = lin(ks[4], ks[5], hidden, out_dim)
    return {"w1": w1, "b1": b1, "w2": w2, "b2": b2, "w3": w3, "b3": b3}


def _reference_f32(x, p):
    h1 = jnp.maximum(x @ p["w1"].T + p["b1"], 0.0)
    h2 = jnp.maximum(h1 @ p["w2"].T + p["b2"], 0.0)
    return h2 @ p["w3"].T + p["b3"]


def _reference_bf16(x, p):
    # Same bf16-operand / f32-accumulate semantics as the kernel.
    mm = lambda a, b: jnp.dot(a.astype(jnp.bfloat16), b.astype(jnp.bfloat16),
                              preferred_element_type=jnp.float32)
    h1 = jnp.maximum(mm(x, p["w1"].T) + p["b1"], 0.0)
    h2 = jnp.maximum(mm(h1, p["w2"].T) + p["b2"], 0.0)
    return mm(h2, p["w3"].T) + p["b3"]


if __name__ == "__main__":
    key = jax.random.PRNGKey(0)
    k_param, k_x = jax.random.split(key)

    in_dim, out_dim = 4, 2                     # CartPole-like state/action dims
    params = init_params(k_param, in_dim, out_dim)
    prep = prepare_params(params)              # one-time layout conversion

    # 1) Training-size batch -> kernel path with a 2-step "parallel" grid.
    x_train = jax.random.normal(k_x, (2048, in_dim), dtype=jnp.float32)
    q = jax.block_until_ready(net_forward(x_train, prep))
    assert q.shape == (2048, out_dim)
    assert jnp.allclose(q, _reference_bf16(x_train, params), atol=2e-3, rtol=2e-3), \
        "train-batch mismatch vs bf16-matmul reference"

    # 2) Awkward batch size -> partial trailing block (masked), no 2x padding blowup.
    x_odd = jax.random.normal(jax.random.PRNGKey(1), (520, in_dim), dtype=jnp.float32)
    q_odd = jax.block_until_ready(net_forward(x_odd, prep))
    assert q_odd.shape == (520, out_dim)
    assert jnp.allclose(q_odd, _reference_bf16(x_odd, params), atol=2e-3, rtol=2e-3), \
        "odd-batch mismatch vs bf16-matmul reference"

    # 3) Tiny batch forced through the kernel (remainder rows handled by 8-row pad).
    x_small = jax.random.normal(jax.random.PRNGKey(2), (13, in_dim), dtype=jnp.float32)
    q_small = jax.block_until_ready(
        net_forward(x_small, prep, small_batch_threshold=0))
    assert q_small.shape == (13, out_dim)
    assert jnp.allclose(q_small, _reference_bf16(x_small, params), atol=2e-3, rtol=2e-3)
    assert jnp.allclose(q_small, _reference_f32(x_small, params), atol=5e-2, rtol=5e-2), \
        "mismatch vs f32 PyTorch-convention reference"

    # 4) Tiny inference batch -> jnp bypass path (same semantics, no kernel launch).
    x_inf = jax.random.normal(jax.random.PRNGKey(3), (8, in_dim), dtype=jnp.float32)
    q_inf = jax.block_until_ready(net_forward(x_inf, prep))
    assert q_inf.shape == (8, out_dim)
    assert jnp.allclose(q_inf, _reference_bf16(x_inf, params), atol=2e-3, rtol=2e-3)

    print("KERNEL_OK")
</pallas_src>

<mosaic_0001>
module attributes {stable_mosaic.version = 11 : i64} {
  func.func @_mlp_kernel(%arg0: i32, %arg1: memref<1024x4xf32, #tpu.memory_space<vmem>>, %arg2: memref<4x128xbf16, #tpu.memory_space<vmem>>, %arg3: memref<1x128xf32, #tpu.memory_space<vmem>>, %arg4: memref<128x128xbf16, #tpu.memory_space<vmem>>, %arg5: memref<1x128xf32, #tpu.memory_space<vmem>>, %arg6: memref<128x128xbf16, #tpu.memory_space<vmem>>, %arg7: memref<1x128xf32, #tpu.memory_space<vmem>>, %arg8: memref<1024x2xf32, #tpu.memory_space<vmem>>) attributes {dimension_semantics = [#tpu.dimension_semantics<parallel>], iteration_bounds = array<i64: 2>, scalar_prefetch = 0 : i64, scratch_operands = 0 : i64, tpu.core_type = #tpu.core_type<tc>, window_params = [{transform_indices = @transform_0, window_bounds = array<i64: 1024, 4>}, {pipeline_mode = #tpu.pipeline_mode<synchronous>, transform_indices = @transform_1, window_bounds = array<i64: 4, 128>}, {pipeline_mode = #tpu.pipeline_mode<synchronous>, transform_indices = @transform_2, window_bounds = array<i64: 1, 128>}, {pipeline_mode = #tpu.pipeline_mode<synchronous>, transform_indices = @transform_3, window_bounds = array<i64: 128, 128>}, {pipeline_mode = #tpu.pipeline_mode<synchronous>, transform_indices = @transform_4, window_bounds = array<i64: 1, 128>}, {pipeline_mode = #tpu.pipeline_mode<synchronous>, transform_indices = @transform_5, window_bounds = array<i64: 128, 128>}, {pipeline_mode = #tpu.pipeline_mode<synchronous>, transform_indices = @transform_6, window_bounds = array<i64: 1, 128>}, {transform_indices = @transform_7, window_bounds = array<i64: 1024, 2>}]} {
    %c0 = arith.constant 0 : index
    %c0_0 = arith.constant 0 : index
    %0 = vector.load %arg1[%c0, %c0_0] : memref<1024x4xf32, #tpu.memory_space<vmem>>, vector<1024x4xf32>
    %1 = arith.truncf %0 : vector<1024x4xf32> to vector<1024x4xbf16>
    %c0_1 = arith.constant 0 : index
    %c0_2 = arith.constant 0 : index
    %2 = vector.load %arg2[%c0_1, %c0_2] : memref<4x128xbf16, #tpu.memory_space<vmem>>, vector<4x128xbf16>
    %cst = arith.constant dense<0.000000e+00> : vector<1024x128xf32>
    %3 = tpu.matmul %1, %2, %cst {dimension_numbers = #tpu.dot_dimension_numbers<[1], [0], [0], [1], [0, 0, 1, 1], [], []>} : vector<1024x4xbf16>, vector<4x128xbf16>, vector<1024x128xf32> -> vector<1024x128xf32>
    %c0_3 = arith.constant 0 : index
    %c0_4 = arith.constant 0 : index
    %4 = vector.load %arg3[%c0_3, %c0_4] : memref<1x128xf32, #tpu.memory_space<vmem>>, vector<1x128xf32>
    %5 = vector.broadcast %4 : vector<1x128xf32> to vector<1024x128xf32>
    %6 = arith.addf %3, %5 : vector<1024x128xf32>
    %cst_5 = arith.constant 0.000000e+00 : f32
    %7 = vector.broadcast %cst_5 : f32 to vector<1024x128xf32>
    %8 = arith.maximumf %6, %7 : vector<1024x128xf32>
    %9 = arith.truncf %8 : vector<1024x128xf32> to vector<1024x128xbf16>
    %c0_6 = arith.constant 0 : index
    %c0_7 = arith.constant 0 : index
    %10 = vector.load %arg4[%c0_6, %c0_7] : memref<128x128xbf16, #tpu.memory_space<vmem>>, vector<128x128xbf16>
    %cst_8 = arith.constant dense<0.000000e+00> : vector<1024x128xf32>
    %11 = tpu.matmul %9, %10, %cst_8 {dimension_numbers = #tpu.dot_dimension_numbers<[1], [0], [0], [1], [0, 0, 1, 1], [], []>} : vector<1024x128xbf16>, vector<128x128xbf16>, vector<1024x128xf32> -> vector<1024x128xf32>
    %c0_9 = arith.constant 0 : index
    %c0_10 = arith.constant 0 : index
    %12 = vector.load %arg5[%c0_9, %c0_10] : memref<1x128xf32, #tpu.memory_space<vmem>>, vector<1x128xf32>
    %13 = vector.broadcast %12 : vector<1x128xf32> to vector<1024x128xf32>
    %14 = arith.addf %11, %13 : vector<1024x128xf32>
    %cst_11 = arith.constant 0.000000e+00 : f32
    %15 = vector.broadcast %cst_11 : f32 to vector<1024x128xf32>
    %16 = arith.maximumf %14, %15 : vector<1024x128xf32>
    %17 = arith.truncf %16 : vector<1024x128xf32> to vector<1024x128xbf16>
    %c0_12 = arith.constant 0 : index
    %c0_13 = arith.constant 0 : index
    %18 = vector.load %arg6[%c0_12, %c0_13] : memref<128x128xbf16, #tpu.memory_space<vmem>>, vector<128x128xbf16>
    %cst_14 = arith.constant dense<0.000000e+00> : vector<1024x128xf32>
    %19 = tpu.matmul %17, %18, %cst_14 {dimension_numbers = #tpu.dot_dimension_numbers<[1], [0], [0], [1], [0, 0, 1, 1], [], []>} : vector<1024x128xbf16>, vector<128x128xbf16>, vector<1024x128xf32> -> vector<1024x128xf32>
    %c0_15 = arith.constant 0 : index
    %c0_16 = arith.constant 0 : index
    %20 = vector.load %arg7[%c0_15, %c0_16] : memref<1x128xf32, #tpu.memory_space<vmem>>, vector<1x128xf32>
    %21 = vector.broadcast %20 : vector<1x128xf32> to vector<1024x128xf32>
    %22 = arith.addf %19, %21 : vector<1024x128xf32>
    %23 = vector.extract_strided_slice %22 {offsets = [0, 0], sizes = [1024, 2], strides = [1, 1]} : vector<1024x128xf32> to vector<1024x2xf32>
    %c0_17 = arith.constant 0 : index
    %c0_18 = arith.constant 0 : index
    %24 = vector.load %arg8[%c0_17, %c0_18] : memref<1024x2xf32, #tpu.memory_space<vmem>>, vector<1024x2xf32>
    tpu.vector_store %arg8[%c0_17, %c0_18], %23 {strides = array<i32>} : memref<1024x2xf32, #tpu.memory_space<vmem>>, vector<1024x2xf32>,
    return
  }
  func.func @transform_0(%arg0: i32) -> (i32, i32) {
    %c0_i32 = arith.constant 0 : i32
    %c0_i32_0 = arith.constant 0 : i32
    return %arg0, %c0_i32 : i32, i32
  }
  func.func @transform_1(%arg0: i32) -> (i32, i32) {
    %c0_i32 = arith.constant 0 : i32
    %c0_i32_0 = arith.constant 0 : i32
    %c0_i32_1 = arith.constant 0 : i32
    return %c0_i32, %c0_i32_0 : i32, i32
  }
  func.func @transform_2(%arg0: i32) -> (i32, i32) {
    %c0_i32 = arith.constant 0 : i32
    %c0_i32_0 = arith.constant 0 : i32
    %c0_i32_1 = arith.constant 0 : i32
    return %c0_i32, %c0_i32_0 : i32, i32
  }
  func.func @transform_3(%arg0: i32) -> (i32, i32) {
    %c0_i32 = arith.constant 0 : i32
    %c0_i32_0 = arith.constant 0 : i32
    %c0_i32_1 = arith.constant 0 : i32
    return %c0_i32, %c0_i32_0 : i32, i32
  }
  func.func @transform_4(%arg0: i32) -> (i32, i32) {
    %c0_i32 = arith.constant 0 : i32
    %c0_i32_0 = arith.constant 0 : i32
    %c0_i32_1 = arith.constant 0 : i32
    return %c0_i32, %c0_i32_0 : i32, i32
  }
  func.func @transform_5(%arg0: i32) -> (i32, i32) {
    %c0_i32 = arith.constant 0 : i32
    %c0_i32_0 = arith.constant 0 : i32
    %c0_i32_1 = arith.constant 0 : i32
    return %c0_i32, %c0_i32_0 : i32, i32
  }
  func.func @transform_6(%arg0: i32) -> (i32, i32) {
    %c0_i32 = arith.constant 0 : i32
    %c0_i32_0 = arith.constant 0 : i32
    %c0_i32_1 = arith.constant 0 : i32
    return %c0_i32, %c0_i32_0 : i32, i32
  }
  func.func @transform_7(%arg0: i32) -> (i32, i32) {
    %c0_i32 = arith.constant 0 : i32
    %c0_i32_0 = arith.constant 0 : i32
    return %arg0, %c0_i32 : i32, i32
  }
}

</mosaic_0001>

<bundles_post_ra>
// kernel: tpu_custom_call.1
= control target key start
LH: loop header
LB: loop body
LE: loop exit
PB: predicated region body
PF: predicated region fallthrough
CT: control target
= control target key end

     0   :  { %s2614_s24 = smov 0   ;;  %s3696_s0 = inlined_call_operand.vmem [shape: f32[2048,4], index: 0, kind: input, shape index: {}]   ;;  %s3697_s1 = inlined_call_operand.vmem [shape: bf16[4,128], index: 1, kind: input, shape index: {}]   ;;  %s3698_s2 = inlined_call_operand.vmem [shape: f32[1,128], index: 2, kind: input, shape index: {}]   ;;  %s3699_s3 = inlined_call_operand.vmem [shape: bf16[128,128], index: 3, kind: input, shape index: {}]   ;;  %s3700_s4 = inlined_call_operand.vmem [shape: f32[1,128], index: 4, kind: input, shape index: {}]   ;;  %s3701_s5 = inlined_call_operand.vmem [shape: bf16[128,128], index: 5, kind: input, shape index: {}]   ;;  %s3702_s6 = inlined_call_operand.vmem [shape: f32[1,128], index: 6, kind: input, shape index: {}]   ;;  %s3703_s7 = inlined_call_operand.vmem [shape: f32[2048,2], index: 7, kind: output, shape index: {}]  }
   0x1 LB: > { %s2369_s25 = sadd.s32 4294967295, %s2572_s24   ;;  %p2373_p0 = scmp.ge.s32.totalorder %s2572_s24, 1  ;;  %s2572_s24 = sphi %s2614_s24, %s17_s24  }
   0x2   : > { %p238_p1 = scmp.lt.s32.totalorder %s2572_s24, 3 }
   0x4   : > { %p239_p2 = pnand %p2373_p0, %p238_p1 }
   0x5   : > { %s2374_s28 = sshll.u32 (!%p239_p2), %s2369_s25, 7 }
   0x6   : > { %242 = sbr.rel (%p239_p2) target bundleno = 1564 (0x61c), region = 48  ;;  %p271_p3 = scmp.lt.s32.totalorder (!%p239_p2), %s2374_s28, 255 }
   0xb   : > { %v475_v0 = vld [vmem:[%s3697_s1] sm:$0x3]  ;;  %vm673_vm0 = vcmask 1041408   ;;  %s3705_s28 = smov (!%p271_p3, %s2374_s28), 255  ;;  %vm480_vm1 = vcmask 31744   ;;  %v2515_v17 = vld [vmem:[%s3699_s3 + $0x38] sm:$0xff] }
   0xc   : > { %v675_v1 = vsel %vm673_vm0, %v475_v0, 0  ;;  %s2375_s29 = sshll.u32 %s3705_s28, 3  ;;  %1266 = vmatpush.bf16.msra.mxu1 %v2515_v17  ;;  %v2514_v21 = vld [vmem:[%s3699_s3 + $0x30] sm:$0xff]  ;;  %v2513_v22 = vld [vmem:[%s3699_s3 + $0x28] sm:$0xff]  ;;  %v2512_v23 = vld [vmem:[%s3699_s3 + $0x20] sm:$0xff]  ;;  %vm2184_vm2 = vcmask 15360  }
   0xd   : > { %684 = vmatpush.bf16.msra.mxu0 %v675_v1  ;;  %2524 = vmatpush.bf16.msra.mxu3 %v675_v1  ;;  %s2633_s9 = scalar_lea.vmem %s3696_s0, %s2375_s29  ;;  %v2511_v26 = vld [vmem:[%s3699_s3 + $0x18] sm:$0xff]  ;;  %v2510_v28 = vld [vmem:[%s3699_s3 + $0x10] sm:$0xff]  ;;  %v2509_v29 = vld [vmem:[%s3699_s3 + $0x8] sm:$0xff]  ;;  %s2837_s12 = scalar_lea.vmem %s3703_s7, %s2375_s29 }
   0xe   : > { %v283_v2 = vld [vmem:[%s2633_s9] sm:$0xff]  ;;  %v284_v3 = vld [vmem:[%s2633_s9 + $0x8] sm:$0xff]  ;;  %v285_v5 = vld [vmem:[%s2633_s9 + $0x10] sm:$0xff] }
   0xf   : > { %v411_v4 = vpack.c.bf16 %v284_v3, %v283_v2  ;;  %v286_v6 = vld [vmem:[%s2633_s9 + $0x18] sm:$0xff]  ;;  %v287_v8 = vld [vmem:[%s2633_s9 + $0x20] sm:$0xff]  ;;  %v288_v9 = vld [vmem:[%s2633_s9 + $0x28] sm:$0xff] }
  0x10   : > { %v412_v7 = vpack.c.bf16 %v286_v6, %v285_v5  ;;  %v413_v10 = vpack.c.bf16 %v288_v9, %v287_v8  ;;  %v289_v11 = vld [vmem:[%s2633_s9 + $0x30] sm:$0xff]  ;;  %v290_v12 = vld [vmem:[%s2633_s9 + $0x38] sm:$0xff]  ;;  %v291_v14 = vld [vmem:[%s2633_s9 + $0x40] sm:$0xff]  ;;  %1267 = vmatpush.bf16.msra.mxu1 %v2514_v21 }
  0x11   : > { %2378 = vmatmul.msk.bf16.vlgmr.msra.gmra.mxu0 %vm480_vm1, %v411_v4  ;;  %v414_v13 = vpack.c.bf16 %v290_v12, %v289_v11  ;;  %v292_v15 = vld [vmem:[%s2633_s9 + $0x48] sm:$0xff]  ;;  %2525 = vmatpush.bf16.msrb.mxu3 %v2515_v17  ;;  %v293_v18 = vld [vmem:[%s2633_s9 + $0x50] sm:$0xff]  ;;  %v294_v19 = vld [vmem:[%s2633_s9 + $0x58] sm:$0xff] }
  0x12   : > { %v415_v16 = vpack.c.bf16 %v292_v15, %v291_v14  ;;  %v416_v20 = vpack.c.bf16 %v294_v19, %v293_v18  ;;  %v295_v24 = vld [vmem:[%s2633_s9 + $0x60] sm:$0xff]  ;;  %v296_v25 = vld [vmem:[%s2633_s9 + $0x68] sm:$0xff]  ;;  %v297_v31 = vld [vmem:[%s2633_s9 + $0x70] sm:$0xff] }
  0x13   : > { %v417_v27 = vpack.c.bf16 %v296_v25, %v295_v24  ;;  %v2508_v30 = vld [vmem:[%s3699_s3] sm:$0xff]  ;;  %v298_v32 = vld [vmem:[%s2633_s9 + $0x78] sm:$0xff]  ;;  %v300_v35 = vld [vmem:[%s2633_s9 + $0x88] sm:$0xff] }
  0x14   : > { %1268 = vmatpush.bf16.msra.mxu1 %v2513_v22  ;;  %v418_v33 = vpack.c.bf16 %v298_v32, %v297_v31  ;;  %v299_v34 = vld [vmem:[%s2633_s9 + $0x80] sm:$0xff]  ;;  %v301_v44 = vld [vmem:[%s2633_s9 + $0x90] sm:$0xff]  ;;  %v302_v45 = vld [vmem:[%s2633_s9 + $0x98] sm:$0xff] }
  0x15   : > { %2526 = vmatpush.bf16.msrb.mxu3 %v2514_v21  ;;  %v419_v36 = vpack.c.bf16 %v300_v35, %v299_v34  ;;  %v2688_v38 = vld [vmem:[%s3698_s2] ss:$0 sm:$0xff]  ;;  %v420_v47 = vpack.c.bf16 %v302_v45, %v301_v44  ;;  %v304_v55 = vld [vmem:[%s2633_s9 + $0xa8] sm:$0xff]  ;;  %v305_v0 = vld [vmem:[%s2633_s9 + $0xb0] sm:$0xff] }
  0x16   : > { %v303_v54 = vld [vmem:[%s2633_s9 + $0xa0] sm:$0xff]  ;;  %v306_v1 = vld [vmem:[%s2633_s9 + $0xb8] sm:$0xff]  ;;  %v308_v11 = vld [vmem:[%s2633_s9 + $0xc8] sm:$0xff] }
  0x17   : > { %v421_v57 = vpack.c.bf16 %v304_v55, %v303_v54  ;;  %v422_v3 = vpack.c.bf16 %v306_v1, %v305_v0  ;;  %v310_v21 = vld [vmem:[%s2633_s9 + $0xd8] sm:$0xff]  ;;  %v311_v31 = vld [vmem:[%s2633_s9 + $0xe0] sm:$0xff]  ;;  %v312_v32 = vld [vmem:[%s2633_s9 + $0xe8] sm:$0xff] }
  0x18   : > { %1269 = vmatpush.bf16.msra.mxu1 %v2512_v23  ;;  %v2522_v34 = vld [vmem:[%s3701_s5 + $0x30] sm:$0xff]  ;;  %v425_v35 = vpack.c.bf16 %v312_v32, %v311_v31 }
  0x19   : > { %2527 = vmatpush.bf16.msrb.mxu3 %v2513_v22 }
  0x1c   : > { %1270 = vmatpush.bf16.msra.mxu1 %v2511_v26 }
  0x1d   : > { %2528 = vmatpush.bf16.msrb.mxu3 %v2512_v23 }
  0x20   : > { %1271 = vmatpush.bf16.msra.mxu1 %v2510_v28 }
  0x21   : > { %2379 = vmatmul.msk.bf16.gmra.mxu0 %vm480_vm1, %v412_v7  ;;  %2529 = vmatpush.bf16.msrb.mxu3 %v2511_v26 }
  0x24   : > { %1272 = vmatpush.bf16.msra.mxu1 %v2509_v29 }
  0x25   : > { %2530 = vmatpush.bf16.msrb.mxu3 %v2510_v28  ;;  %v2523_v28 = vld [vmem:[%s3701_s5 + $0x38] sm:$0xff] }
  0x26   : > { %1855 = vmatpush.bf16.msra.mxu2 %v2523_v28 }
  0x28   : > { %1273 = vmatpush.bf16.msra.mxu1 %v2508_v30 }
  0x29   : > { %2531 = vmatpush.bf16.msrb.mxu3 %v2509_v29 }
  0x2a   : > { %1856 = vmatpush.bf16.msra.mxu2 %v2522_v34 }
  0x2d   : > { %2532 = vmatpush.bf16.msrb.mxu3 %v2508_v30 }
  0x31   : > { %2380 = vmatmul.msk.bf16.gmra.mxu0 %vm480_vm1, %v413_v10  ;;  %v307_v10 = vld [vmem:[%s2633_s9 + $0xc0] sm:$0xff] }
  0x41   : > { %2381 = vmatmul.msk.bf16.gmra.mxu0 %vm480_vm1, %v414_v13  ;;  %v423_v13 = vpack.c.bf16 %v308_v11, %v307_v10 }
  0x51   : > { %2382 = vmatmul.msk.bf16.gmra.mxu0 %vm480_vm1, %v415_v16 }
  0x61   : > { %2383 = vmatmul.msk.bf16.gmra.mxu0 %vm480_vm1, %v416_v20  ;;  %v309_v20 = vld [vmem:[%s2633_s9 + $0xd0] sm:$0xff] }
  0x62   : > { %v424_v23 = vpack.c.bf16 %v310_v21, %v309_v20 }
  0x71   : > { %2384 = vmatmul.msk.bf16.gmra.mxu0 %vm480_vm1, %v417_v27 }
  0x81   : > { %2385 = vmatmul.msk.bf16.gmra.mxu0 %vm480_vm1, %v418_v33 }
  0x8e   : > { %v686_v37 = vpop.f32.mrf.mxu0 }
  0x8f   : > { %v687_v39 = vadd.f32 %v2688_v38, %v686_v37  ;;  %v2521_v37 = vld [vmem:[%s3701_s5 + $0x28] sm:$0xff] }
  0x90   : > { %1857 = vmatpush.bf16.msra.mxu2 %v2521_v37 }
  0x91   : > { %2386 = vmatmul.msk.bf16.gmra.mxu0 %vm480_vm1, %v419_v36  ;;  %v1006_v42 = vmax.f32 %v687_v39, 0.0  ;;  %v2520_v39 = vld [vmem:[%s3701_s5 + $0x20] sm:$0xff] }
  0x94   : > { %1858 = vmatpush.bf16.msra.mxu2 %v2520_v39 }
  0x96   : > { %v688_v40 = vpop.f32.mrf.mxu0 }
  0x97   : > { %v689_v41 = vadd.f32 %v2688_v38, %v688_v40 }
  0x99   : > { %v1007_v43 = vmax.f32 %v689_v41, 0.0 }
  0x9b   : > { %v1134_v46 = vpack.c.bf16 %v1007_v43, %v1006_v42  ;;  %v2519_v43 = vld [vmem:[%s3701_s5 + $0x18] sm:$0xff] }
  0x9c   : > { %1859 = vmatpush.bf16.msra.mxu2 %v2519_v43  ;;  %v322_v43 = vld [vmem:[%s2633_s9 + $0x138] sm:$0xff] }
  0x9d   : > { %1274 = vmatmul.bf16.vlgmr.msra.gmra.mxu1 %v1134_v46  ;;  %v313_v46 = vld [vmem:[%s2633_s9 + $0xf0] sm:$0xff] }
  0x9e   : > { %v691_v48 = vpop.f32.mrf.mxu0 }
  0x9f   : > { %v692_v49 = vadd.f32 %v2688_v38, %v691_v48 }
  0xa1   : > { %2387 = vmatmul.msk.bf16.gmra.mxu0 %vm480_vm1, %v420_v47  ;;  %v1008_v52 = vmax.f32 %v692_v49, 0.0  ;;  %v314_v47 = vld [vmem:[%s2633_s9 + $0xf8] sm:$0xff]  ;;  %v2518_v49 = vld [vmem:[%s3701_s5 + $0x10] sm:$0xff] }
  0xa2   : > { %1860 = vmatpush.bf16.msra.mxu2 %v2518_v49 }
  0xa6   : > { %v693_v50 = vpop.f32.mrf.mxu0 }
  0xa7   : > { %v694_v51 = vadd.f32 %v2688_v38, %v693_v50  ;;  %v426_v50 = vpack.c.bf16 %v314_v47, %v313_v46 }
  0xa9   : > { %v1009_v53 = vmax.f32 %v694_v51, 0.0 }
  0xab   : > { %v1135_v56 = vpack.c.bf16 %v1009_v53, %v1008_v52  ;;  %v2517_v52 = vld [vmem:[%s3701_s5 + $0x8] sm:$0xff]  ;;  %v2516_v53 = vld [vmem:[%s3701_s5] sm:$0xff] }
  0xac   : > { %1861 = vmatpush.bf16.msra.mxu2 %v2517_v52 }
  0xad   : > { %1279 = vmatmul.bf16.gmra.mxu1 %v1135_v56 }
  0xae   : > { %v696_v58 = vpop.f32.mrf.mxu0 }
  0xaf   : > { %v697_v59 = vadd.f32 %v2688_v38, %v696_v58 }
  0xb0   : > { %1862 = vmatpush.bf16.msra.mxu2 %v2516_v53 }
  0xb1   : > { %2388 = vmatmul.msk.bf16.gmra.mxu0 %vm480_vm1, %v421_v57  ;;  %v1010_v62 = vmax.f32 %v697_v59, 0.0  ;;  %v315_v59 = vld [vmem:[%s2633_s9 + $0x100] sm:$0xff] }
  0xb6   : > { %v698_v60 = vpop.f32.mrf.mxu0 }
  0xb7   : > { %v699_v61 = vadd.f32 %v2688_v38, %v698_v60  ;;  %v316_v60 = vld [vmem:[%s2633_s9 + $0x108] sm:$0xff] }
  0xb9   : > { %v1011_v63 = vmax.f32 %v699_v61, 0.0 }
  0xbb   : > { %v1136_v2 = vpack.c.bf16 %v1011_v63, %v1010_v62  ;;  %v427_v62 = vpack.c.bf16 %v316_v60, %v315_v59  ;;  %v323_v59 = vld [vmem:[%s2633_s9 + $0x140] sm:$0xff]  ;;  %v324_v60 = vld [vmem:[%s2633_s9 + $0x148] sm:$0xff] }
  0xbd   : > { %1284 = vmatmul.bf16.gmra.mxu1 %v1136_v2 }
  0xbe   : > { %v701_v4 = vpop.f32.mrf.mxu0 }
  0xbf   : > { %v702_v5 = vadd.f32 %v2688_v38, %v701_v4 }
  0xc1   : > { %2389 = vmatmul.msk.bf16.gmra.mxu0 %vm480_vm1, %v422_v3  ;;  %v1012_v8 = vmax.f32 %v702_v5, 0.0 }
  0xc6   : > { %v703_v6 = vpop.f32.mrf.mxu0 }
  0xc7   : > { %v704_v7 = vadd.f32 %v2688_v38, %v703_v6  ;;  %v317_v6 = vld [vmem:[%s2633_s9 + $0x110] sm:$0xff] }
  0xc9   : > { %v1013_v9 = vmax.f32 %v704_v7, 0.0  ;;  %v318_v7 = vld [vmem:[%s2633_s9 + $0x118] sm:$0xff] }
  0xca   : > { %v428_v10 = vpack.c.bf16 %v318_v7, %v317_v6 }
  0xcb   : > { %v1137_v12 = vpack.c.bf16 %v1013_v9, %v1012_v8  ;;  %v2762_v9 = vld [vmem:[%s3700_s4] ss:$0 sm:$0xff] }
  0xcd   : > { %1289 = vmatmul.bf16.gmra.mxu1 %v1137_v12 }
  0xce   : > { %v706_v14 = vpop.f32.mrf.mxu0 }
  0xcf   : > { %v707_v15 = vadd.f32 %v2688_v38, %v706_v14 }
  0xd1   : > { %2390 = vmatmul.msk.bf16.gmra.mxu0 %vm480_vm1, %v423_v13  ;;  %v1014_v18 = vmax.f32 %v707_v15, 0.0 }
  0xd6   : > { %v708_v16 = vpop.f32.mrf.mxu0 }
  0xd7   : > { %v709_v17 = vadd.f32 %v2688_v38, %v708_v16 }
  0xd9   : > { %v1015_v19 = vmax.f32 %v709_v17, 0.0 }
  0xdb   : > { %v1138_v22 = vpack.c.bf16 %v1015_v19, %v1014_v18 }
  0xdd   : > { %1294 = vmatmul.bf16.gmra.mxu1 %v1138_v22 }
  0xde   : > { %v711_v24 = vpop.f32.mrf.mxu0 }
  0xdf   : > { %v712_v25 = vadd.f32 %v2688_v38, %v711_v24  ;;  %v319_v24 = vld [vmem:[%s2633_s9 + $0x120] sm:$0xff] }
  0xe1   : > { %2391 = vmatmul.msk.bf16.gmra.mxu0 %vm480_vm1, %v424_v23  ;;  %v1016_v29 = vmax.f32 %v712_v25, 0.0  ;;  %v320_v25 = vld [vmem:[%s2633_s9 + $0x128] sm:$0xff] }
  0xe6   : > { %v713_v26 = vpop.f32.mrf.mxu0 }
  0xe7   : > { %v714_v27 = vadd.f32 %v2688_v38, %v713_v26 }
  0xe9   : > { %v1017_v30 = vmax.f32 %v714_v27, 0.0  ;;  %v429_v27 = vpack.c.bf16 %v320_v25, %v319_v24 }
  0xeb   : > { %v1139_v33 = vpack.c.bf16 %v1017_v30, %v1016_v29 }
  0xed   : > { %1299 = vmatmul.bf16.gmra.mxu1 %v1139_v33 }
  0xee   : > { %v716_v36 = vpop.f32.mrf.mxu0 }
  0xef   : > { %v717_v40 = vadd.f32 %v2688_v38, %v716_v36 }
  0xf1   : > { %2392 = vmatmul.msk.bf16.gmra.mxu0 %vm480_vm1, %v425_v35  ;;  %v1018_v44 = vmax.f32 %v717_v40, 0.0 }
  0xf6   : > { %v718_v41 = vpop.f32.mrf.mxu0 }
  0xf7   : > { %v719_v42 = vadd.f32 %v2688_v38, %v718_v41 }
  0xf9   : > { %v1019_v45 = vmax.f32 %v719_v42, 0.0  ;;  %v321_v42 = vld [vmem:[%s2633_s9 + $0x130] sm:$0xff] }
  0xfb   : > { %v1140_v48 = vpack.c.bf16 %v1019_v45, %v1018_v44  ;;  %v430_v45 = vpack.c.bf16 %v322_v43, %v321_v42 }
  0xfd   : > { %1304 = vmatmul.bf16.gmra.mxu1 %v1140_v48 }
  0xfe   : > { %v721_v51 = vpop.f32.mrf.mxu0 }
  0xff   : > { %v722_v54 = vadd.f32 %v2688_v38, %v721_v51 }
 0x101   : > { %2393 = vmatmul.msk.bf16.gmra.mxu0 %vm480_vm1, %v426_v50  ;;  %v1020_v57 = vmax.f32 %v722_v54, 0.0 }
 0x106   : > { %v723_v55 = vpop.f32.mrf.mxu0 }
 0x107   : > { %v724_v56 = vadd.f32 %v2688_v38, %v723_v55 }
 0x109   : > { %v1021_v58 = vmax.f32 %v724_v56, 0.0 }
 0x10b   : > { %v1141_v61 = vpack.c.bf16 %v1021_v58, %v1020_v57 }
 0x10d   : > { %1309 = vmatmul.bf16.gmra.mxu1 %v1141_v61 }
 0x10e   : > { %v726_v63 = vpop.f32.mrf.mxu0 }
 0x10f   : > { %v727_v0 = vadd.f32 %v2688_v38, %v726_v63 }
 0x111   : > { %2394 = vmatmul.msk.bf16.gmra.mxu0 %vm480_vm1, %v427_v62  ;;  %v1022_v3 = vmax.f32 %v727_v0, 0.0  ;;  %v431_v62 = vpack.c.bf16 %v324_v60, %v323_v59 }
 0x116   : > { %v728_v1 = vpop.f32.mrf.mxu0 }
 0x117   : > { %v729_v2 = vadd.f32 %v2688_v38, %v728_v1 }
 0x119   : > { %v1023_v4 = vmax.f32 %v729_v2, 0.0 }
 0x11a   : > { %v1275_v5 = vpop.f32.mrf.mxu1 }
 0x11b   : > { %v1142_v8 = vpack.c.bf16 %v1023_v4, %v1022_v3  ;;  %v1276_v12 = vadd.f32 %v2762_v9, %v1275_v5 }
 0x11d   : > { %1314 = vmatmul.bf16.gmra.mxu1 %v1142_v8  ;;  %v1595_v15 = vmax.f32 %v1276_v12, 0.0 }
 0x11e   : > { %v731_v11 = vpop.f32.mrf.mxu0 }
 0x11f   : > { %v732_v16 = vadd.f32 %v2688_v38, %v731_v11 }
 0x121   : > { %2395 = vmatmul.msk.bf16.gmra.mxu0 %vm480_vm1, %v428_v10  ;;  %v1024_v21 = vmax.f32 %v732_v16, 0.0 }
 0x122   : > { %v1277_v13 = vpop.f32.mrf.mxu1 }
 0x123   : > { %v1278_v14 = vadd.f32 %v2762_v9, %v1277_v13  ;;  %v325_v13 = vld [vmem:[%s2633_s9 + $0x150] sm:$0xff] }
 0x125   : > { %v1596_v17 = vmax.f32 %v1278_v14, 0.0  ;;  %v326_v14 = vld [vmem:[%s2633_s9 + $0x158] sm:$0xff] }
 0x126   : > { %v733_v18 = vpop.f32.mrf.mxu0  ;;  %v432_v16 = vpack.c.bf16 %v326_v14, %v325_v13 }
 0x127   : > { %v734_v19 = vadd.f32 %v2688_v38, %v733_v18  ;;  %v1723_v20 = vpack.c.bf16 %v1596_v17, %v1595_v15 }
 0x129   : > { %v1025_v22 = vmax.f32 %v734_v19, 0.0  ;;  %1863 = vmatmul.bf16.vlgmr.msra.gmra.mxu2 %v1723_v20 }
 0x12a   : > { %v1280_v23 = vpop.f32.mrf.mxu1 }
 0x12b   : > { %v1143_v26 = vpack.c.bf16 %v1025_v22, %v1024_v21  ;;  %v1281_v29 = vadd.f32 %v2762_v9, %v1280_v23 }
 0x12d   : > { %1319 = vmatmul.bf16.gmra.mxu1 %v1143_v26  ;;  %v1597_v32 = vmax.f32 %v1281_v29, 0.0 }
 0x12e   : > { %v736_v28 = vpop.f32.mrf.mxu0 }
 0x12f   : > { %v737_v33 = vadd.f32 %v2688_v38, %v736_v28 }
 0x131   : > { %2396 = vmatmul.msk.bf16.gmra.mxu0 %vm480_vm1, %v429_v27  ;;  %v1026_v39 = vmax.f32 %v737_v33, 0.0 }
 0x132   : > { %v1282_v30 = vpop.f32.mrf.mxu1 }
 0x133   : > { %v1283_v31 = vadd.f32 %v2762_v9, %v1282_v30  ;;  %v327_v30 = vld [vmem:[%s2633_s9 + $0x160] sm:$0xff] }
 0x135   : > { %v1598_v34 = vmax.f32 %v1283_v31, 0.0  ;;  %v328_v31 = vld [vmem:[%s2633_s9 + $0x168] sm:$0xff] }
 0x136   : > { %v738_v35 = vpop.f32.mrf.mxu0  ;;  %v433_v33 = vpack.c.bf16 %v328_v31, %v327_v30 }
 0x137   : > { %v739_v36 = vadd.f32 %v2688_v38, %v738_v35  ;;  %v1724_v37 = vpack.c.bf16 %v1598_v34, %v1597_v32 }
 0x139   : > { %v1027_v40 = vmax.f32 %v739_v36, 0.0  ;;  %1868 = vmatmul.bf16.gmra.mxu2 %v1724_v37 }
 0x13a   : > { %v1285_v41 = vpop.f32.mrf.mxu1 }
 0x13b   : > { %v1144_v44 = vpack.c.bf16 %v1027_v40, %v1026_v39  ;;  %v1286_v47 = vadd.f32 %v2762_v9, %v1285_v41 }
 0x13d   : > { %1324 = vmatmul.bf16.gmra.mxu1 %v1144_v44  ;;  %v1599_v50 = vmax.f32 %v1286_v47, 0.0 }
 0x13e   : > { %v741_v46 = vpop.f32.mrf.mxu0 }
 0x13f   : > { %v742_v51 = vadd.f32 %v2688_v38, %v741_v46 }
 0x141   : > { %2397 = vmatmul.msk.bf16.gmra.mxu0 %vm480_vm1, %v430_v45  ;;  %v1028_v56 = vmax.f32 %v742_v51, 0.0 }
 0x142   : > { %v1287_v48 = vpop.f32.mrf.mxu1 }
 0x143   : > { %v1288_v49 = vadd.f32 %v2762_v9, %v1287_v48  ;;  %v329_v48 = vld [vmem:[%s2633_s9 + $0x170] sm:$0xff] }
 0x145   : > { %v1600_v52 = vmax.f32 %v1288_v49, 0.0  ;;  %v330_v49 = vld [vmem:[%s2633_s9 + $0x178] sm:$0xff] }
 0x146   : > { %v743_v53 = vpop.f32.mrf.mxu0  ;;  %v434_v51 = vpack.c.bf16 %v330_v49, %v329_v48 }
 0x147   : > { %v744_v54 = vadd.f32 %v2688_v38, %v743_v53  ;;  %v1725_v55 = vpack.c.bf16 %v1600_v52, %v1599_v50 }
 0x149   : > { %v1029_v57 = vmax.f32 %v744_v54, 0.0  ;;  %1873 = vmatmul.bf16.gmra.mxu2 %v1725_v55 }
 0x14a   : > { %v1290_v58 = vpop.f32.mrf.mxu1 }
 0x14b   : > { %v1145_v61 = vpack.c.bf16 %v1029_v57, %v1028_v56  ;;  %v1291_v0 = vadd.f32 %v2762_v9, %v1290_v58 }
 0x14d   : > { %1329 = vmatmul.bf16.gmra.mxu1 %v1145_v61  ;;  %v1601_v3 = vmax.f32 %v1291_v0, 0.0 }
 0x14e   : > { %v746_v63 = vpop.f32.mrf.mxu0 }
 0x14f   : > { %v747_v4 = vadd.f32 %v2688_v38, %v746_v63 }
 0x151   : > { %2398 = vmatmul.msk.bf16.gmra.mxu0 %vm480_vm1, %v431_v62  ;;  %v1030_v10 = vmax.f32 %v747_v4, 0.0 }
 0x152   : > { %v1292_v1 = vpop.f32.mrf.mxu1 }
 0x153   : > { %v1293_v2 = vadd.f32 %v2762_v9, %v1292_v1  ;;  %v331_v1 = vld [vmem:[%s2633_s9 + $0x180] sm:$0xff] }
 0x155   : > { %v1602_v5 = vmax.f32 %v1293_v2, 0.0  ;;  %v332_v2 = vld [vmem:[%s2633_s9 + $0x188] sm:$0xff] }
 0x156   : > { %v748_v6 = vpop.f32.mrf.mxu0  ;;  %v435_v4 = vpack.c.bf16 %v332_v2, %v331_v1 }
 0x157   : > { %v749_v7 = vadd.f32 %v2688_v38, %v748_v6  ;;  %v1726_v8 = vpack.c.bf16 %v1602_v5, %v1601_v3 }
 0x159   : > { %v1031_v11 = vmax.f32 %v749_v7, 0.0  ;;  %1878 = vmatmul.bf16.gmra.mxu2 %v1726_v8 }
 0x15a   : > { %v1295_v12 = vpop.f32.mrf.mxu1 }
 0x15b   : > { %v1146_v15 = vpack.c.bf16 %v1031_v11, %v1030_v10  ;;  %v1296_v18 = vadd.f32 %v2762_v9, %v1295_v12 }
 0x15d   : > { %1334 = vmatmul.bf16.gmra.mxu1 %v1146_v15  ;;  %v1603_v21 = vmax.f32 %v1296_v18, 0.0 }
 0x15e   : > { %v751_v17 = vpop.f32.mrf.mxu0 }
 0x15f   : > { %v752_v22 = vadd.f32 %v2688_v38, %v751_v17 }
 0x161   : > { %2399 = vmatmul.msk.bf16.gmra.mxu0 %vm480_vm1, %v432_v16  ;;  %v1032_v27 = vmax.f32 %v752_v22, 0.0 }
 0x162   : > { %v1297_v19 = vpop.f32.mrf.mxu1 }
 0x163   : > { %v1298_v20 = vadd.f32 %v2762_v9, %v1297_v19  ;;  %v333_v19 = vld [vmem:[%s2633_s9 + $0x190] sm:$0xff] }
 0x165   : > { %v1604_v23 = vmax.f32 %v1298_v20, 0.0  ;;  %v334_v20 = vld [vmem:[%s2633_s9 + $0x198] sm:$0xff] }
 0x166   : > { %v753_v24 = vpop.f32.mrf.mxu0  ;;  %v436_v22 = vpack.c.bf16 %v334_v20, %v333_v19 }
 0x167   : > { %v754_v25 = vadd.f32 %v2688_v38, %v753_v24  ;;  %v1727_v26 = vpack.c.bf16 %v1604_v23, %v1603_v21 }
 0x169   : > { %v1033_v28 = vmax.f32 %v754_v25, 0.0  ;;  %1883 = vmatmul.bf16.gmra.mxu2 %v1727_v26 }
 0x16a   : > { %v1300_v29 = vpop.f32.mrf.mxu1 }
 0x16b   : > { %v1147_v32 = vpack.c.bf16 %v1033_v28, %v1032_v27  ;;  %v1301_v35 = vadd.f32 %v2762_v9, %v1300_v29 }
 0x16d   : > { %1339 = vmatmul.bf16.gmra.mxu1 %v1147_v32  ;;  %v1605_v39 = vmax.f32 %v1301_v35, 0.0  ;;  %v2828_v35 = vld [vmem:[%s3702_s6] ss:$0 sm:$0xff] }
 0x16e   : > { %v756_v34 = vpop.f32.mrf.mxu0 }
 0x16f   : > { %v757_v40 = vadd.f32 %v2688_v38, %v756_v34 }
 0x171   : > { %2400 = vmatmul.msk.bf16.gmra.mxu0 %vm480_vm1, %v433_v33  ;;  %v1034_v45 = vmax.f32 %v757_v40, 0.0 }
 0x172   : > { %v1302_v36 = vpop.f32.mrf.mxu1 }
 0x173   : > { %v1303_v37 = vadd.f32 %v2762_v9, %v1302_v36 }
 0x175   : > { %v1606_v41 = vmax.f32 %v1303_v37, 0.0  ;;  %v335_v37 = vld [vmem:[%s2633_s9 + $0x1a0] sm:$0xff] }
 0x176   : > { %v758_v42 = vpop.f32.mrf.mxu0 }
 0x177   : > { %v759_v43 = vadd.f32 %v2688_v38, %v758_v42  ;;  %v1728_v44 = vpack.c.bf16 %v1606_v41, %v1605_v39  ;;  %v336_v39 = vld [vmem:[%s2633_s9 + $0x1a8] sm:$0xff] }
 0x179   : > { %v1035_v46 = vmax.f32 %v759_v43, 0.0  ;;  %1888 = vmatmul.bf16.gmra.mxu2 %v1728_v44  ;;  %v437_v43 = vpack.c.bf16 %v336_v39, %v335_v37 }
 0x17a   : > { %v1305_v47 = vpop.f32.mrf.mxu1 }
 0x17b   : > { %v1148_v50 = vpack.c.bf16 %v1035_v46, %v1034_v45  ;;  %v1306_v53 = vadd.f32 %v2762_v9, %v1305_v47 }
 0x17d   : > { %1344 = vmatmul.bf16.gmra.mxu1 %v1148_v50  ;;  %v1607_v56 = vmax.f32 %v1306_v53, 0.0 }
 0x17e   : > { %v761_v52 = vpop.f32.mrf.mxu0 }
 0x17f   : > { %v762_v57 = vadd.f32 %v2688_v38, %v761_v52 }
 0x181   : > { %2401 = vmatmul.msk.bf16.gmra.mxu0 %vm480_vm1, %v434_v51  ;;  %v1036_v62 = vmax.f32 %v762_v57, 0.0 }
 0x182   : > { %v1307_v54 = vpop.f32.mrf.mxu1 }
 0x183   : > { %v1308_v55 = vadd.f32 %v2762_v9, %v1307_v54 }
 0x185   : > { %v1608_v58 = vmax.f32 %v1308_v55, 0.0 }
 0x186   : > { %v763_v59 = vpop.f32.mrf.mxu0 }
 0x187   : > { %v764_v60 = vadd.f32 %v2688_v38, %v763_v59  ;;  %v1729_v61 = vpack.c.bf16 %v1608_v58, %v1607_v56  ;;  %v337_v59 = vld [vmem:[%s2633_s9 + $0x1b0] sm:$0xff] }
 0x189   : > { %v1037_v63 = vmax.f32 %v764_v60, 0.0  ;;  %1893 = vmatmul.bf16.gmra.mxu2 %v1729_v61  ;;  %v338_v60 = vld [vmem:[%s2633_s9 + $0x1b8] sm:$0xff] }
 0x18a   : > { %v1310_v0 = vpop.f32.mrf.mxu1 }
 0x18b   : > { %v1149_v3 = vpack.c.bf16 %v1037_v63, %v1036_v62  ;;  %v1311_v6 = vadd.f32 %v2762_v9, %v1310_v0  ;;  %v438_v0 = vpack.c.bf16 %v338_v60, %v337_v59 }
 0x18d   : > { %1349 = vmatmul.bf16.gmra.mxu1 %v1149_v3  ;;  %v1609_v10 = vmax.f32 %v1311_v6, 0.0 }
 0x18e   : > { %v766_v5 = vpop.f32.mrf.mxu0 }
 0x18f   : > { %v767_v11 = vadd.f32 %v2688_v38, %v766_v5 }
 0x191   : > { %2402 = vmatmul.msk.bf16.gmra.mxu0 %vm480_vm1, %v435_v4  ;;  %v1038_v16 = vmax.f32 %v767_v11, 0.0 }
 0x192   : > { %v1312_v7 = vpop.f32.mrf.mxu1 }
 0x193   : > { %v1313_v8 = vadd.f32 %v2762_v9, %v1312_v7 }
 0x195   : > { %v1610_v12 = vmax.f32 %v1313_v8, 0.0 }
 0x196   : > { %v768_v13 = vpop.f32.mrf.mxu0 }
 0x197   : > { %v769_v14 = vadd.f32 %v2688_v38, %v768_v13  ;;  %v1730_v15 = vpack.c.bf16 %v1610_v12, %v1609_v10 }
 0x199   : > { %v1039_v17 = vmax.f32 %v769_v14, 0.0  ;;  %1898 = vmatmul.bf16.gmra.mxu2 %v1730_v15 }
 0x19a   : > { %v1315_v18 = vpop.f32.mrf.mxu1 }
 0x19b   : > { %v1150_v21 = vpack.c.bf16 %v1039_v17, %v1038_v16  ;;  %v1316_v24 = vadd.f32 %v2762_v9, %v1315_v18  ;;  %v339_v17 = vld [vmem:[%s2633_s9 + $0x1c0] sm:$0xff]  ;;  %v340_v18 = vld [vmem:[%s2633_s9 + $0x1c8] sm:$0xff] }
 0x19d   : > { %1354 = vmatmul.bf16.gmra.mxu1 %v1150_v21  ;;  %v1611_v27 = vmax.f32 %v1316_v24, 0.0 }
 0x19e   : > { %v771_v23 = vpop.f32.mrf.mxu0 }
 0x19f   : > { %v772_v28 = vadd.f32 %v2688_v38, %v771_v23 }
 0x1a1   : > { %2403 = vmatmul.msk.bf16.gmra.mxu0 %vm480_vm1, %v436_v22  ;;  %v1040_v33 = vmax.f32 %v772_v28, 0.0  ;;  %v439_v22 = vpack.c.bf16 %v340_v18, %v339_v17 }
 0x1a2   : > { %v1317_v25 = vpop.f32.mrf.mxu1 }
 0x1a3   : > { %v1318_v26 = vadd.f32 %v2762_v9, %v1317_v25 }
 0x1a5   : > { %v1612_v29 = vmax.f32 %v1318_v26, 0.0 }
 0x1a6   : > { %v773_v30 = vpop.f32.mrf.mxu0 }
 0x1a7   : > { %v774_v31 = vadd.f32 %v2688_v38, %v773_v30  ;;  %v1731_v32 = vpack.c.bf16 %v1612_v29, %v1611_v27 }
 0x1a9   : > { %v1041_v34 = vmax.f32 %v774_v31, 0.0  ;;  %1903 = vmatmul.bf16.gmra.mxu2 %v1731_v32 }
 0x1aa   : > { %v1320_v36 = vpop.f32.mrf.mxu1 }
 0x1ab   : > { %v1151_v40 = vpack.c.bf16 %v1041_v34, %v1040_v33  ;;  %v1321_v45 = vadd.f32 %v2762_v9, %v1320_v36 }
 0x1ac   : > { %v1864_v41 = vpop.f32.mrf.mxu2 }
 0x1ad   : > { %v1865_v42 = vadd.f32 %v2828_v35, %v1864_v41  ;;  %1359 = vmatmul.bf16.gmra.mxu1 %v1151_v40  ;;  %v1613_v49 = vmax.f32 %v1321_v45, 0.0  ;;  %v341_v40 = vld [vmem:[%s2633_s9 + $0x1d0] sm:$0xff]  ;;  %v342_v41 = vld [vmem:[%s2633_s9 + $0x1d8] sm:$0xff] }
 0x1ae   : > { %v776_v44 = vpop.f32.mrf.mxu0  ;;  %v440_v45 = vpack.c.bf16 %v342_v41, %v341_v40 }
 0x1af   : > { %2185 = vst.msk [vmem:[%s2837_s12] sm:$0xff] %vm2184_vm2, %v1865_v42  ;;  %v777_v50 = vadd.f32 %v2688_v38, %v776_v44 }
 0x1b1   : > { %2404 = vmatmul.msk.bf16.gmra.mxu0 %vm480_vm1, %v437_v43  ;;  %v1042_v56 = vmax.f32 %v777_v50, 0.0 }
 0x1b2   : > { %v1322_v46 = vpop.f32.mrf.mxu1 }
 0x1b3   : > { %v1323_v47 = vadd.f32 %v2762_v9, %v1322_v46 }
 0x1b4   : > { %v1866_v48 = vpop.f32.mrf.mxu2 }
 0x1b5   : > { %v1614_v51 = vmax.f32 %v1323_v47, 0.0  ;;  %v1867_v52 = vadd.f32 %v2828_v35, %v1866_v48 }
 0x1b6   : > { %v778_v53 = vpop.f32.mrf.mxu0 }
 0x1b7   : > { %2186 = vst.msk [vmem:[%s2837_s12 + $0x8] sm:$0xff] %vm2184_vm2, %v1867_v52  ;;  %v779_v54 = vadd.f32 %v2688_v38, %v778_v53  ;;  %v1732_v55 = vpack.c.bf16 %v1614_v51, %v1613_v49 }
 0x1b9   : > { %v1043_v57 = vmax.f32 %v779_v54, 0.0  ;;  %1908 = vmatmul.bf16.gmra.mxu2 %v1732_v55 }
 0x1ba   : > { %v1325_v58 = vpop.f32.mrf.mxu1 }
 0x1bb   : > { %v1152_v61 = vpack.c.bf16 %v1043_v57, %v1042_v56  ;;  %v1326_v2 = vadd.f32 %v2762_v9, %v1325_v58 }
 0x1bc   : > { %v1869_v62 = vpop.f32.mrf.mxu2 }
 0x1bd   : > { %v1870_v63 = vadd.f32 %v2828_v35, %v1869_v62  ;;  %1364 = vmatmul.bf16.gmra.mxu1 %v1152_v61  ;;  %v1615_v6 = vmax.f32 %v1326_v2, 0.0  ;;  %v343_v61 = vld [vmem:[%s2633_s9 + $0x1e0] sm:$0xff]  ;;  %v344_v62 = vld [vmem:[%s2633_s9 + $0x1e8] sm:$0xff] }
 0x1be   : > { %v781_v1 = vpop.f32.mrf.mxu0  ;;  %v441_v2 = vpack.c.bf16 %v344_v62, %v343_v61 }
 0x1bf   : > { %2187 = vst.msk [vmem:[%s2837_s12 + $0x10] sm:$0xff] %vm2184_vm2, %v1870_v63  ;;  %v782_v7 = vadd.f32 %v2688_v38, %v781_v1 }
 0x1c1   : > { %2405 = vmatmul.msk.bf16.gmra.mxu0 %vm480_vm1, %v438_v0  ;;  %v1044_v14 = vmax.f32 %v782_v7, 0.0 }
 0x1c2   : > { %v1327_v3 = vpop.f32.mrf.mxu1 }
 0x1c3   : > { %v1328_v4 = vadd.f32 %v2762_v9, %v1327_v3 }
 0x1c4   : > { %v1871_v5 = vpop.f32.mrf.mxu2 }
 0x1c5   : > { %v1616_v8 = vmax.f32 %v1328_v4, 0.0  ;;  %v1872_v10 = vadd.f32 %v2828_v35, %v1871_v5 }
 0x1c6   : > { %v783_v11 = vpop.f32.mrf.mxu0 }
 0x1c7   : > { %2188 = vst.msk [vmem:[%s2837_s12 + $0x18] sm:$0xff] %vm2184_vm2, %v1872_v10  ;;  %v784_v12 = vadd.f32 %v2688_v38, %v783_v11  ;;  %v1733_v13 = vpack.c.bf16 %v1616_v8, %v1615_v6 }
 0x1c9   : > { %v1045_v15 = vmax.f32 %v784_v12, 0.0  ;;  %1913 = vmatmul.bf16.gmra.mxu2 %v1733_v13 }
 0x1ca   : > { %v1330_v16 = vpop.f32.mrf.mxu1 }
 0x1cb   : > { %v1153_v19 = vpack.c.bf16 %v1045_v15, %v1044_v14  ;;  %v1331_v24 = vadd.f32 %v2762_v9, %v1330_v16 }
 0x1cc   : > { %v1874_v20 = vpop.f32.mrf.mxu2 }
 0x1cd   : > { %v1875_v21 = vadd.f32 %v2828_v35, %v1874_v20  ;;  %1369 = vmatmul.bf16.gmra.mxu1 %v1153_v19  ;;  %v1617_v28 = vmax.f32 %v1331_v24, 0.0  ;;  %v345_v19 = vld [vmem:[%s2633_s9 + $0x1f0] sm:$0xff]  ;;  %v346_v20 = vld [vmem:[%s2633_s9 + $0x1f8] sm:$0xff] }
 0x1ce   : > { %v786_v23 = vpop.f32.mrf.mxu0  ;;  %v442_v24 = vpack.c.bf16 %v346_v20, %v345_v19 }
 0x1cf   : > { %2189 = vst.msk [vmem:[%s2837_s12 + $0x20] sm:$0xff] %vm2184_vm2, %v1875_v21  ;;  %v787_v29 = vadd.f32 %v2688_v38, %v786_v23 }
 0x1d1   : > { %2406 = vmatmul.msk.bf16.gmra.mxu0 %vm480_vm1, %v439_v22  ;;  %v1046_v36 = vmax.f32 %v787_v29, 0.0 }
 0x1d2   : > { %v1332_v25 = vpop.f32.mrf.mxu1 }
 0x1d3   : > { %v1333_v26 = vadd.f32 %v2762_v9, %v1332_v25 }
 0x1d4   : > { %v1876_v27 = vpop.f32.mrf.mxu2 }
 0x1d5   : > { %v1618_v30 = vmax.f32 %v1333_v26, 0.0  ;;  %v1877_v31 = vadd.f32 %v2828_v35, %v1876_v27 }
 0x1d6   : > { %v788_v32 = vpop.f32.mrf.mxu0 }
 0x1d7   : > { %2190 = vst.msk [vmem:[%s2837_s12 + $0x28] sm:$0xff] %vm2184_vm2, %v1877_v31  ;;  %v789_v33 = vadd.f32 %v2688_v38, %v788_v32  ;;  %v1734_v34 = vpack.c.bf16 %v1618_v30, %v1617_v28 }
 0x1d9   : > { %v1047_v37 = vmax.f32 %v789_v33, 0.0  ;;  %1918 = vmatmul.bf16.gmra.mxu2 %v1734_v34 }
 0x1da   : > { %v1335_v39 = vpop.f32.mrf.mxu1 }
 0x1db   : > { %v1154_v42 = vpack.c.bf16 %v1047_v37, %v1046_v36  ;;  %v1336_v47 = vadd.f32 %v2762_v9, %v1335_v39 }
 0x1dc   : > { %v1879_v43 = vpop.f32.mrf.mxu2 }
 0x1dd   : > { %v1880_v44 = vadd.f32 %v2828_v35, %v1879_v43  ;;  %1374 = vmatmul.bf16.gmra.mxu1 %v1154_v42  ;;  %v1619_v51 = vmax.f32 %v1336_v47, 0.0  ;;  %v347_v42 = vld [vmem:[%s2633_s9 + $0x200] sm:$0xff]  ;;  %v348_v43 = vld [vmem:[%s2633_s9 + $0x208] sm:$0xff] }
 0x1de   : > { %v791_v46 = vpop.f32.mrf.mxu0  ;;  %v443_v47 = vpack.c.bf16 %v348_v43, %v347_v42 }
 0x1df   : > { %2191 = vst.msk [vmem:[%s2837_s12 + $0x30] sm:$0xff] %vm2184_vm2, %v1880_v44  ;;  %v792_v52 = vadd.f32 %v2688_v38, %v791_v46 }
 0x1e1   : > { %2407 = vmatmul.msk.bf16.gmra.mxu0 %vm480_vm1, %v440_v45  ;;  %v1048_v58 = vmax.f32 %v792_v52, 0.0 }
 0x1e2   : > { %v1337_v48 = vpop.f32.mrf.mxu1 }
 0x1e3   : > { %v1338_v49 = vadd.f32 %v2762_v9, %v1337_v48 }
 0x1e4   : > { %v1881_v50 = vpop.f32.mrf.mxu2 }
 0x1e5   : > { %v1620_v53 = vmax.f32 %v1338_v49, 0.0  ;;  %v1882_v54 = vadd.f32 %v2828_v35, %v1881_v50 }
 0x1e6   : > { %v793_v55 = vpop.f32.mrf.mxu0 }
 0x1e7   : > { %2192 = vst.msk [vmem:[%s2837_s12 + $0x38] sm:$0xff] %vm2184_vm2, %v1882_v54  ;;  %v794_v56 = vadd.f32 %v2688_v38, %v793_v55  ;;  %v1735_v57 = vpack.c.bf16 %v1620_v53, %v1619_v51 }
 0x1e9   : > { %v1049_v59 = vmax.f32 %v794_v56, 0.0  ;;  %1923 = vmatmul.bf16.gmra.mxu2 %v1735_v57 }
 0x1ea   : > { %v1340_v60 = vpop.f32.mrf.mxu1 }
 0x1eb   : > { %v1155_v63 = vpack.c.bf16 %v1049_v59, %v1048_v58  ;;  %v1341_v4 = vadd.f32 %v2762_v9, %v1340_v60 }
 0x1ec   : > { %v1884_v0 = vpop.f32.mrf.mxu2 }
 0x1ed   : > { %v1885_v1 = vadd.f32 %v2828_v35, %v1884_v0  ;;  %1379 = vmatmul.bf16.gmra.mxu1 %v1155_v63  ;;  %v1621_v8 = vmax.f32 %v1341_v4, 0.0  ;;  %v349_v63 = vld [vmem:[%s2633_s9 + $0x210] sm:$0xff]  ;;  %v350_v0 = vld [vmem:[%s2633_s9 + $0x218] sm:$0xff] }
 0x1ee   : > { %v796_v3 = vpop.f32.mrf.mxu0  ;;  %v444_v4 = vpack.c.bf16 %v350_v0, %v349_v63 }
 0x1ef   : > { %2193 = vst.msk [vmem:[%s2837_s12 + $0x40] sm:$0xff] %vm2184_vm2, %v1885_v1  ;;  %v797_v10 = vadd.f32 %v2688_v38, %v796_v3 }
 0x1f1   : > { %2408 = vmatmul.msk.bf16.gmra.mxu0 %vm480_vm1, %v441_v2  ;;  %v1050_v16 = vmax.f32 %v797_v10, 0.0 }
 0x1f2   : > { %v1342_v5 = vpop.f32.mrf.mxu1 }
 0x1f3   : > { %v1343_v6 = vadd.f32 %v2762_v9, %v1342_v5 }
 0x1f4   : > { %v1886_v7 = vpop.f32.mrf.mxu2 }
 0x1f5   : > { %v1622_v11 = vmax.f32 %v1343_v6, 0.0  ;;  %v1887_v12 = vadd.f32 %v2828_v35, %v1886_v7 }
 0x1f6   : > { %v798_v13 = vpop.f32.mrf.mxu0 }
 0x1f7   : > { %2194 = vst.msk [vmem:[%s2837_s12 + $0x48] sm:$0xff] %vm2184_vm2, %v1887_v12  ;;  %v799_v14 = vadd.f32 %v2688_v38, %v798_v13  ;;  %v1736_v15 = vpack.c.bf16 %v1622_v11, %v1621_v8 }
 0x1f9   : > { %v1051_v17 = vmax.f32 %v799_v14, 0.0  ;;  %1928 = vmatmul.bf16.gmra.mxu2 %v1736_v15 }
 0x1fa   : > { %v1345_v18 = vpop.f32.mrf.mxu1 }
 0x1fb   : > { %v1156_v21 = vpack.c.bf16 %v1051_v17, %v1050_v16  ;;  %v1346_v26 = vadd.f32 %v2762_v9, %v1345_v18 }
 0x1fc   : > { %v1889_v22 = vpop.f32.mrf.mxu2 }
 0x1fd   : > { %v1890_v23 = vadd.f32 %v2828_v35, %v1889_v22  ;;  %1384 = vmatmul.bf16.gmra.mxu1 %v1156_v21  ;;  %v1623_v30 = vmax.f32 %v1346_v26, 0.0  ;;  %v351_v21 = vld [vmem:[%s2633_s9 + $0x220] sm:$0xff]  ;;  %v352_v22 = vld [vmem:[%s2633_s9 + $0x228] sm:$0xff] }
 0x1fe   : > { %v801_v25 = vpop.f32.mrf.mxu0  ;;  %v445_v26 = vpack.c.bf16 %v352_v22, %v351_v21 }
 0x1ff   : > { %2195 = vst.msk [vmem:[%s2837_s12 + $0x50] sm:$0xff] %vm2184_vm2, %v1890_v23  ;;  %v802_v31 = vadd.f32 %v2688_v38, %v801_v25 }
 0x201   : > { %2409 = vmatmul.msk.bf16.gmra.mxu0 %vm480_vm1, %v442_v24  ;;  %v1052_v39 = vmax.f32 %v802_v31, 0.0 }
 0x202   : > { %v1347_v27 = vpop.f32.mrf.mxu1 }
 0x203   : > { %v1348_v28 = vadd.f32 %v2762_v9, %v1347_v27 }
 0x204   : > { %v1891_v29 = vpop.f32.mrf.mxu2 }
 0x205   : > { %v1624_v32 = vmax.f32 %v1348_v28, 0.0  ;;  %v1892_v33 = vadd.f32 %v2828_v35, %v1891_v29 }
 0x206   : > { %v803_v34 = vpop.f32.mrf.mxu0 }
 0x207   : > { %2196 = vst.msk [vmem:[%s2837_s12 + $0x58] sm:$0xff] %vm2184_vm2, %v1892_v33  ;;  %v804_v36 = vadd.f32 %v2688_v38, %v803_v34  ;;  %v1737_v37 = vpack.c.bf16 %v1624_v32, %v1623_v30  ;;  %v2952_v32 = vld [vmem:[%s3698_s2] ss:$0 sm:$0xff] }
 0x209   : > { %v1053_v40 = vmax.f32 %v804_v36, 0.0  ;;  %1933 = vmatmul.bf16.gmra.mxu2 %v1737_v37 }
 0x20a   : > { %v1350_v41 = vpop.f32.mrf.mxu1 }
 0x20b   : > { %v1157_v44 = vpack.c.bf16 %v1053_v40, %v1052_v39  ;;  %v1351_v49 = vadd.f32 %v2762_v9, %v1350_v41 }
 0x20c   : > { %v1894_v45 = vpop.f32.mrf.mxu2 }
 0x20d   : > { %v1895_v46 = vadd.f32 %v2828_v35, %v1894_v45  ;;  %1389 = vmatmul.bf16.gmra.mxu1 %v1157_v44  ;;  %v1625_v53 = vmax.f32 %v1351_v49, 0.0  ;;  %v353_v44 = vld [vmem:[%s2633_s9 + $0x230] sm:$0xff]  ;;  %v354_v45 = vld [vmem:[%s2633_s9 + $0x238] sm:$0xff] }
 0x20e   : > { %v806_v48 = vpop.f32.mrf.mxu0  ;;  %v446_v49 = vpack.c.bf16 %v354_v45, %v353_v44 }
 0x20f   : > { %2197 = vst.msk [vmem:[%s2837_s12 + $0x60] sm:$0xff] %vm2184_vm2, %v1895_v46  ;;  %v807_v54 = vadd.f32 %v2688_v38, %v806_v48 }
 0x211   : > { %2410 = vmatmul.msk.bf16.gmra.mxu0 %vm480_vm1, %v443_v47  ;;  %v1054_v60 = vmax.f32 %v807_v54, 0.0 }
 0x212   : > { %v1352_v50 = vpop.f32.mrf.mxu1 }
 0x213   : > { %v1353_v51 = vadd.f32 %v2762_v9, %v1352_v50 }
 0x214   : > { %v1896_v52 = vpop.f32.mrf.mxu2 }
 0x215   : > { %v1626_v55 = vmax.f32 %v1353_v51, 0.0  ;;  %v1897_v56 = vadd.f32 %v2828_v35, %v1896_v52 }
 0x216   : > { %v808_v57 = vpop.f32.mrf.mxu0 }
 0x217   : > { %2198 = vst.msk [vmem:[%s2837_s12 + $0x68] sm:$0xff] %vm2184_vm2, %v1897_v56  ;;  %v809_v58 = vadd.f32 %v2688_v38, %v808_v57  ;;  %v1738_v59 = vpack.c.bf16 %v1626_v55, %v1625_v53 }
 0x219   : > { %v1055_v61 = vmax.f32 %v809_v58, 0.0  ;;  %1938 = vmatmul.bf16.gmra.mxu2 %v1738_v59 }
 0x21a   : > { %v1355_v62 = vpop.f32.mrf.mxu1 }
 0x21b   : > { %v1158_v1 = vpack.c.bf16 %v1055_v61, %v1054_v60  ;;  %v1356_v6 = vadd.f32 %v2762_v9, %v1355_v62 }
 0x21c   : > { %v1899_v2 = vpop.f32.mrf.mxu2 }
 0x21d   : > { %v1900_v3 = vadd.f32 %v2828_v35, %v1899_v2  ;;  %1394 = vmatmul.bf16.gmra.mxu1 %v1158_v1  ;;  %v1627_v11 = vmax.f32 %v1356_v6, 0.0  ;;  %v355_v1 = vld [vmem:[%s2633_s9 + $0x240] sm:$0xff]  ;;  %v356_v2 = vld [vmem:[%s2633_s9 + $0x248] sm:$0xff] }
 0x21e   : > { %v811_v5 = vpop.f32.mrf.mxu0  ;;  %v447_v6 = vpack.c.bf16 %v356_v2, %v355_v1  ;;  %v361_v2 = vld [vmem:[%s2633_s9 + $0x270] sm:$0xff] }
 0x21f   : > { %2199 = vst.msk [vmem:[%s2837_s12 + $0x70] sm:$0xff] %vm2184_vm2, %v1900_v3  ;;  %v812_v12 = vadd.f32 %v2688_v38, %v811_v5 }
 0x221   : > { %2411 = vmatmul.msk.bf16.gmra.mxu0 %vm480_vm1, %v444_v4  ;;  %v1056_v18 = vmax.f32 %v812_v12, 0.0 }
 0x222   : > { %v1357_v7 = vpop.f32.mrf.mxu1 }
 0x223   : > { %v1358_v8 = vadd.f32 %v2762_v9, %v1357_v7 }
 0x224   : > { %v1901_v10 = vpop.f32.mrf.mxu2 }
 0x225   : > { %v1628_v13 = vmax.f32 %v1358_v8, 0.0  ;;  %v1902_v14 = vadd.f32 %v2828_v35, %v1901_v10 }
 0x226   : > { %v813_v15 = vpop.f32.mrf.mxu0 }
 0x227   : > { %2200 = vst.msk [vmem:[%s2837_s12 + $0x78] sm:$0xff] %vm2184_vm2, %v1902_v14  ;;  %v814_v16 = vadd.f32 %v2688_v38, %v813_v15  ;;  %v1739_v17 = vpack.c.bf16 %v1628_v13, %v1627_v11 }
 0x229   : > { %v1057_v19 = vmax.f32 %v814_v16, 0.0  ;;  %1943 = vmatmul.bf16.gmra.mxu2 %v1739_v17 }
 0x22a   : > { %v1360_v20 = vpop.f32.mrf.mxu1 }
 0x22b   : > { %v1159_v23 = vpack.c.bf16 %v1057_v19, %v1056_v18  ;;  %v1361_v28 = vadd.f32 %v2762_v9, %v1360_v20 }
 0x22c   : > { %v1904_v24 = vpop.f32.mrf.mxu2 }
 0x22d   : > { %v1905_v25 = vadd.f32 %v2828_v35, %v1904_v24  ;;  %1399 = vmatmul.bf16.gmra.mxu1 %v1159_v23  ;;  %v1629_v31 = vmax.f32 %v1361_v28, 0.0  ;;  %v357_v23 = vld [vmem:[%s2633_s9 + $0x250] sm:$0xff]  ;;  %v358_v24 = vld [vmem:[%s2633_s9 + $0x258] sm:$0xff] }
 0x22e   : > { %v816_v27 = vpop.f32.mrf.mxu0  ;;  %v448_v28 = vpack.c.bf16 %v358_v24, %v357_v23  ;;  %v2554_v23 = vld [vmem:[%s3701_s5 + $0x38] sm:$0xff] }
 0x22f   : > { %2201 = vst.msk [vmem:[%s2837_s12 + $0x80] sm:$0xff] %vm2184_vm2, %v1905_v25  ;;  %v817_v33 = vadd.f32 %v2952_v32, %v816_v27 }
 0x231   : > { %2412 = vmatmul.msk.bf16.gmra.mxu0 %vm480_vm1, %v445_v26  ;;  %v1058_v41 = vmax.f32 %v817_v33, 0.0 }
 0x232   : > { %v1362_v38 = vpop.f32.mrf.mxu1 }
 0x233   : > { %v1363_v29 = vadd.f32 %v2762_v9, %v1362_v38 }
 0x234   : > { %v1906_v30 = vpop.f32.mrf.mxu2 }
 0x235   : > { %v1630_v34 = vmax.f32 %v1363_v29, 0.0  ;;  %v1907_v36 = vadd.f32 %v2828_v35, %v1906_v30 }
 0x236   : > { %v818_v37 = vpop.f32.mrf.mxu0 }
 0x237   : > { %2202 = vst.msk [vmem:[%s2837_s12 + $0x88] sm:$0xff] %vm2184_vm2, %v1907_v36  ;;  %v819_v39 = vadd.f32 %v2952_v32, %v818_v37  ;;  %v1740_v40 = vpack.c.bf16 %v1630_v34, %v1629_v31 }
 0x239   : > { %v1059_v42 = vmax.f32 %v819_v39, 0.0  ;;  %1948 = vmatmul.bf16.gmra.mxu2 %v1740_v40 }
 0x23a   : > { %v1365_v43 = vpop.f32.mrf.mxu1 }
 0x23b   : > { %v1160_v46 = vpack.c.bf16 %v1059_v42, %v1058_v41  ;;  %v1366_v51 = vadd.f32 %v2762_v9, %v1365_v43 }
 0x23c   : > { %v1909_v47 = vpop.f32.mrf.mxu2 }
 0x23d   : > { %v1910_v48 = vadd.f32 %v2828_v35, %v1909_v47  ;;  %1404 = vmatmul.bf16.gmra.mxu1 %v1160_v46  ;;  %v1631_v55 = vmax.f32 %v1366_v51, 0.0  ;;  %v359_v46 = vld [vmem:[%s2633_s9 + $0x260] sm:$0xff]  ;;  %v360_v47 = vld [vmem:[%s2633_s9 + $0x268] sm:$0xff] }
 0x23e   : > { %v821_v50 = vpop.f32.mrf.mxu0  ;;  %v449_v51 = vpack.c.bf16 %v360_v47, %v359_v46 }
 0x23f   : > { %2203 = vst.msk [vmem:[%s2837_s12 + $0x90] sm:$0xff] %vm2184_vm2, %v1910_v48  ;;  %v822_v56 = vadd.f32 %v2952_v32, %v821_v50 }
 0x241   : > { %2413 = vmatmul.msk.bf16.gmra.mxu0 %vm480_vm1, %v446_v49  ;;  %v1060_v62 = vmax.f32 %v822_v56, 0.0 }
 0x242   : > { %v1367_v52 = vpop.f32.mrf.mxu1 }
 0x243   : > { %v1368_v53 = vadd.f32 %v2762_v9, %v1367_v52 }
 0x244   : > { %v1911_v54 = vpop.f32.mrf.mxu2 }
 0x245   : > { %v1632_v57 = vmax.f32 %v1368_v53, 0.0  ;;  %v1912_v58 = vadd.f32 %v2828_v35, %v1911_v54 }
 0x246   : > { %v823_v59 = vpop.f32.mrf.mxu0 }
 0x247   : > { %2204 = vst.msk [vmem:[%s2837_s12 + $0x98] sm:$0xff] %vm2184_vm2, %v1912_v58  ;;  %v824_v60 = vadd.f32 %v2952_v32, %v823_v59  ;;  %v1741_v61 = vpack.c.bf16 %v1632_v57, %v1631_v55 }
 0x249   : > { %v1061_v63 = vmax.f32 %v824_v60, 0.0  ;;  %1953 = vmatmul.bf16.gmra.mxu2 %v1741_v61 }
 0x24a   : > { %v1370_v0 = vpop.f32.mrf.mxu1 }
 0x24b   : > { %v1161_v3 = vpack.c.bf16 %v1061_v63, %v1060_v62  ;;  %v1371_v8 = vadd.f32 %v2762_v9, %v1370_v0 }
 0x24c   : > { %v1914_v4 = vpop.f32.mrf.mxu2 }
 0x24d   : > { %v1915_v5 = vadd.f32 %v2828_v35, %v1914_v4  ;;  %1409 = vmatmul.bf16.gmra.mxu1 %v1161_v3  ;;  %v1633_v13 = vmax.f32 %v1371_v8, 0.0  ;;  %v362_v3 = vld [vmem:[%s2633_s9 + $0x278] sm:$0xff] }
 0x24e   : > { %v826_v7 = vpop.f32.mrf.mxu0 }
 0x24f   : > { %2205 = vst.msk [vmem:[%s2837_s12 + $0xa0] sm:$0xff] %vm2184_vm2, %v1915_v5  ;;  %v827_v14 = vadd.f32 %v2952_v32, %v826_v7  ;;  %v450_v7 = vpack.c.bf16 %v362_v3, %v361_v2  ;;  %v2560_v2 = vld [vmem:[%s3701_s5 + $0x8] sm:$0xff] }
 0x251   : > { %2414 = vmatmul.msk.bf16.gmra.mxu0 %vm480_vm1, %v447_v6  ;;  %v1062_v20 = vmax.f32 %v827_v14, 0.0  ;;  %v382_v14 = vld [vmem:[%s2633_s9 + $0x318] sm:$0xff] }
 0x252   : > { %v1372_v10 = vpop.f32.mrf.mxu1 }
 0x253   : > { %v1373_v11 = vadd.f32 %v2762_v9, %v1372_v10  ;;  %v3019_v10 = vld [vmem:[%s3700_s4] ss:$0 sm:$0xff] }
 0x254   : > { %v1916_v12 = vpop.f32.mrf.mxu2 }
 0x255   : > { %v1634_v15 = vmax.f32 %v1373_v11, 0.0  ;;  %v1917_v16 = vadd.f32 %v2828_v35, %v1916_v12 }
 0x256   : > { %v828_v17 = vpop.f32.mrf.mxu0 }
 0x257   : > { %2206 = vst.msk [vmem:[%s2837_s12 + $0xa8] sm:$0xff] %vm2184_vm2, %v1917_v16  ;;  %v829_v18 = vadd.f32 %v2952_v32, %v828_v17  ;;  %v1742_v19 = vpack.c.bf16 %v1634_v15, %v1633_v13  ;;  %v381_v13 = vld [vmem:[%s2633_s9 + $0x310] sm:$0xff] }
 0x258   : > { %v460_v16 = vpack.c.bf16 %v382_v14, %v381_v13 }
 0x259   : > { %v1063_v21 = vmax.f32 %v829_v18, 0.0  ;;  %1958 = vmatmul.bf16.gmra.mxu2 %v1742_v19 }
 0x25a   : > { %v1375_v22 = vpop.f32.mrf.mxu1  ;;  %2427 = vmatmul.msk.bf16.vlgmr.msra.gmra.mxu3 %vm480_vm1, %v460_v16 }
 0x25b   : > { %v1162_v25 = vpack.c.bf16 %v1063_v21, %v1062_v20  ;;  %v1376_v29 = vadd.f32 %v2762_v9, %v1375_v22  ;;  %2533 = vmatpush.bf16.msra.mxu3 %v2554_v23  ;;  %v367_v23 = vld [vmem:[%s2633_s9 + $0x2a0] sm:$0xff] }
 0x25c   : > { %v1919_v26 = vpop.f32.mrf.mxu2 }
 0x25d   : > { %v1920_v27 = vadd.f32 %v2828_v35, %v1919_v26  ;;  %1414 = vmatmul.bf16.gmra.mxu1 %v1162_v25  ;;  %v1635_v34 = vmax.f32 %v1376_v29, 0.0  ;;  %v364_v29 = vld [vmem:[%s2633_s9 + $0x288] sm:$0xff] }
 0x25e   : > { %v831_v38 = vpop.f32.mrf.mxu0 }
 0x25f   : > { %2207 = vst.msk [vmem:[%s2837_s12 + $0xb0] sm:$0xff] %vm2184_vm2, %v1920_v27  ;;  %v832_v36 = vadd.f32 %v2952_v32, %v831_v38  ;;  %v363_v38 = vld [vmem:[%s2633_s9 + $0x280] sm:$0xff] }
 0x261   : > { %2415 = vmatmul.msk.bf16.gmra.mxu0 %vm480_vm1, %v448_v28  ;;  %v1064_v43 = vmax.f32 %v832_v36, 0.0  ;;  %v451_v36 = vpack.c.bf16 %v364_v29, %v363_v38 }
 0x262   : > { %v1377_v30 = vpop.f32.mrf.mxu1 }
 0x263   : > { %v1378_v31 = vadd.f32 %v2762_v9, %v1377_v30  ;;  %v2555_v30 = vld [vmem:[%s3701_s5 + $0x30] sm:$0xff] }
 0x264   : > { %v1921_v33 = vpop.f32.mrf.mxu2  ;;  %2534 = vmatpush.bf16.msra.mxu3 %v2555_v30 }
 0x265   : > { %v1636_v37 = vmax.f32 %v1378_v31, 0.0  ;;  %v1922_v39 = vadd.f32 %v2828_v35, %v1921_v33 }
 0x266   : > { %v833_v40 = vpop.f32.mrf.mxu0 }
 0x267   : > { %2208 = vst.msk [vmem:[%s2837_s12 + $0xb8] sm:$0xff] %vm2184_vm2, %v1922_v39  ;;  %v834_v41 = vadd.f32 %v2952_v32, %v833_v40  ;;  %v1743_v42 = vpack.c.bf16 %v1636_v37, %v1635_v34  ;;  %v2556_v39 = vld [vmem:[%s3701_s5 + $0x28] sm:$0xff] }
 0x268   : > { %2535 = vmatpush.bf16.msra.mxu3 %v2556_v39 }
 0x269   : > { %v1065_v44 = vmax.f32 %v834_v41, 0.0  ;;  %1963 = vmatmul.bf16.gmra.mxu2 %v1743_v42  ;;  %v383_v42 = vld [vmem:[%s2633_s9 + $0x320] sm:$0xff] }
 0x26a   : > { %v1380_v45 = vpop.f32.mrf.mxu1 }
 0x26b   : > { %v1163_v48 = vpack.c.bf16 %v1065_v44, %v1064_v43  ;;  %v1381_v53 = vadd.f32 %v2762_v9, %v1380_v45  ;;  %v384_v43 = vld [vmem:[%s2633_s9 + $0x328] sm:$0xff]  ;;  %v2557_v44 = vld [vmem:[%s3701_s5 + $0x20] sm:$0xff] }
 0x26c   : > { %v1924_v49 = vpop.f32.mrf.mxu2  ;;  %2536 = vmatpush.bf16.msra.mxu3 %v2557_v44  ;;  %v461_v46 = vpack.c.bf16 %v384_v43, %v383_v42 }
 0x26d   : > { %v1925_v50 = vadd.f32 %v2828_v35, %v1924_v49  ;;  %1419 = vmatmul.bf16.gmra.mxu1 %v1163_v48  ;;  %v1637_v57 = vmax.f32 %v1381_v53, 0.0  ;;  %v2558_v53 = vld [vmem:[%s3701_s5 + $0x18] sm:$0xff] }
 0x26e   : > { %v836_v52 = vpop.f32.mrf.mxu0  ;;  %2428 = vmatmul.msk.bf16.gmra.mxu3 %vm480_vm1, %v461_v46 }
 0x26f   : > { %2209 = vst.msk [vmem:[%s2837_s12 + $0xc0] sm:$0xff] %vm2184_vm2, %v1925_v50  ;;  %v837_v58 = vadd.f32 %v2952_v32, %v836_v52 }
 0x270   : > { %2537 = vmatpush.bf16.msra.mxu3 %v2558_v53 }
 0x271   : > { %2416 = vmatmul.msk.bf16.gmra.mxu0 %vm480_vm1, %v449_v51  ;;  %v1066_v0 = vmax.f32 %v837_v58, 0.0 }
 0x272   : > { %v1382_v54 = vpop.f32.mrf.mxu1 }
 0x273   : > { %v1383_v55 = vadd.f32 %v2762_v9, %v1382_v54 }
 0x274   : > { %v1926_v56 = vpop.f32.mrf.mxu2 }
 0x275   : > { %v1638_v59 = vmax.f32 %v1383_v55, 0.0  ;;  %v1927_v60 = vadd.f32 %v2828_v35, %v1926_v56 }
 0x276   : > { %v838_v61 = vpop.f32.mrf.mxu0 }
 0x277   : > { %2210 = vst.msk [vmem:[%s2837_s12 + $0xc8] sm:$0xff] %vm2184_vm2, %v1927_v60  ;;  %v839_v62 = vadd.f32 %v2952_v32, %v838_v61  ;;  %v1744_v63 = vpack.c.bf16 %v1638_v59, %v1637_v57  ;;  %v365_v59 = vld [vmem:[%s2633_s9 + $0x290] sm:$0xff]  ;;  %v366_v60 = vld [vmem:[%s2633_s9 + $0x298] sm:$0xff] }
 0x278   : > { %v2559_v61 = vld [vmem:[%s3701_s5 + $0x10] sm:$0xff] }
 0x279   : > { %v1067_v1 = vmax.f32 %v839_v62, 0.0  ;;  %1968 = vmatmul.bf16.gmra.mxu2 %v1744_v63  ;;  %2538 = vmatpush.bf16.msra.mxu3 %v2559_v61 }
 0x27a   : > { %v1385_v9 = vpop.f32.mrf.mxu1 }
 0x27b   : > { %v1164_v4 = vpack.c.bf16 %v1067_v1, %v1066_v0  ;;  %v1386_v11 = vadd.f32 %v3019_v10, %v1385_v9  ;;  %v452_v1 = vpack.c.bf16 %v366_v60, %v365_v59  ;;  %v390_v59 = vld [vmem:[%s2633_s9 + $0x358] sm:$0xff] }
 0x27c   : > { %v1929_v5 = vpop.f32.mrf.mxu2 }
 0x27d   : > { %v1930_v6 = vadd.f32 %v2828_v35, %v1929_v5  ;;  %1424 = vmatmul.bf16.gmra.mxu1 %v1164_v4  ;;  %v1639_v18 = vmax.f32 %v1386_v11, 0.0  ;;  %2539 = vmatpush.bf16.msra.mxu3 %v2560_v2  ;;  %v385_v5 = vld [vmem:[%s2633_s9 + $0x330] sm:$0xff] }
 0x27e   : > { %v841_v8 = vpop.f32.mrf.mxu0 }
 0x27f   : > { %2211 = vst.msk [vmem:[%s2837_s12 + $0xd0] sm:$0xff] %vm2184_vm2, %v1930_v6  ;;  %v842_v19 = vadd.f32 %v2952_v32, %v841_v8  ;;  %v386_v6 = vld [vmem:[%s2633_s9 + $0x338] sm:$0xff] }
 0x280   : > { %v462_v11 = vpack.c.bf16 %v386_v6, %v385_v5 }
 0x281   : > { %2417 = vmatmul.msk.bf16.gmra.mxu0 %vm480_vm1, %v450_v7  ;;  %v1068_v26 = vmax.f32 %v842_v19, 0.0  ;;  %v2561_v7 = vld [vmem:[%s3701_s5] sm:$0xff] }
 0x282   : > { %v1387_v12 = vpop.f32.mrf.mxu1  ;;  %2540 = vmatpush.bf16.msra.mxu3 %v2561_v7 }
 0x283   : > { %v1388_v15 = vadd.f32 %v3019_v10, %v1387_v12  ;;  %2429 = vmatmul.msk.bf16.gmra.mxu3 %vm480_vm1, %v462_v11  ;;  %v372_v11 = vld [vmem:[%s2633_s9 + $0x2c8] sm:$0xff] }
 0x284   : > { %v1931_v17 = vpop.f32.mrf.mxu2 }
 0x285   : > { %v1640_v20 = vmax.f32 %v1388_v15, 0.0  ;;  %v1932_v21 = vadd.f32 %v2828_v35, %v1931_v17 }
 0x286   : > { %v843_v22 = vpop.f32.mrf.mxu0 }
 0x287   : > { %2212 = vst.msk [vmem:[%s2837_s12 + $0xd8] sm:$0xff] %vm2184_vm2, %v1932_v21  ;;  %v844_v24 = vadd.f32 %v2952_v32, %v843_v22  ;;  %v1745_v25 = vpack.c.bf16 %v1640_v20, %v1639_v18 }
 0x289   : > { %v1069_v27 = vmax.f32 %v844_v24, 0.0  ;;  %1973 = vmatmul.bf16.gmra.mxu2 %v1745_v25  ;;  %v368_v24 = vld [vmem:[%s2633_s9 + $0x2a8] sm:$0xff] }
 0x28a   : > { %v1390_v28 = vpop.f32.mrf.mxu1 }
 0x28b   : > { %v1165_v31 = vpack.c.bf16 %v1069_v27, %v1068_v26  ;;  %v1391_v40 = vadd.f32 %v3019_v10, %v1390_v28  ;;  %v453_v28 = vpack.c.bf16 %v368_v24, %v367_v23 }
 0x28c   : > { %v1934_v33 = vpop.f32.mrf.mxu2 }
 0x28d   : > { %v1935_v34 = vadd.f32 %v2828_v35, %v1934_v33  ;;  %1429 = vmatmul.bf16.gmra.mxu1 %v1165_v31  ;;  %v1641_v48 = vmax.f32 %v1391_v40, 0.0  ;;  %v387_v31 = vld [vmem:[%s2633_s9 + $0x340] sm:$0xff]  ;;  %v388_v33 = vld [vmem:[%s2633_s9 + $0x348] sm:$0xff] }
 0x28e   : > { %v846_v37 = vpop.f32.mrf.mxu0 }
 0x28f   : > { %2213 = vst.msk [vmem:[%s2837_s12 + $0xe0] sm:$0xff] %vm2184_vm2, %v1935_v34  ;;  %v847_v49 = vadd.f32 %v2952_v32, %v846_v37 }
 0x291   : > { %2418 = vmatmul.msk.bf16.gmra.mxu0 %vm480_vm1, %v451_v36  ;;  %v1070_v56 = vmax.f32 %v847_v49, 0.0  ;;  %v463_v36 = vpack.c.bf16 %v388_v33, %v387_v31  ;;  %v369_v49 = vld [vmem:[%s2633_s9 + $0x2b0] sm:$0xff] }
 0x292   : > { %v1392_v41 = vpop.f32.mrf.mxu1 }
 0x293   : > { %v1393_v45 = vadd.f32 %v3019_v10, %v1392_v41  ;;  %2430 = vmatmul.msk.bf16.gmra.mxu3 %vm480_vm1, %v463_v36  ;;  %v374_v36 = vld [vmem:[%s2633_s9 + $0x2d8] sm:$0xff] }
 0x294   : > { %v1936_v47 = vpop.f32.mrf.mxu2 }
 0x295   : > { %v1642_v50 = vmax.f32 %v1393_v45, 0.0  ;;  %v1937_v51 = vadd.f32 %v2828_v35, %v1936_v47 }
 0x296   : > { %v848_v52 = vpop.f32.mrf.mxu0 }
 0x297   : > { %2214 = vst.msk [vmem:[%s2837_s12 + $0xe8] sm:$0xff] %vm2184_vm2, %v1937_v51  ;;  %v849_v54 = vadd.f32 %v2952_v32, %v848_v52  ;;  %v1746_v55 = vpack.c.bf16 %v1642_v50, %v1641_v48  ;;  %v370_v50 = vld [vmem:[%s2633_s9 + $0x2b8] sm:$0xff] }
 0x299   : > { %v1071_v57 = vmax.f32 %v849_v54, 0.0  ;;  %1978 = vmatmul.bf16.gmra.mxu2 %v1746_v55  ;;  %v454_v54 = vpack.c.bf16 %v370_v50, %v369_v49 }
 0x29a   : > { %v1395_v58 = vpop.f32.mrf.mxu1 }
 0x29b   : > { %v1166_v62 = vpack.c.bf16 %v1071_v57, %v1070_v56  ;;  %v1396_v3 = vadd.f32 %v3019_v10, %v1395_v58  ;;  %v389_v58 = vld [vmem:[%s2633_s9 + $0x350] sm:$0xff] }
 0x29c   : > { %v1939_v63 = vpop.f32.mrf.mxu2  ;;  %v464_v61 = vpack.c.bf16 %v390_v59, %v389_v58 }
 0x29d   : > { %v1940_v0 = vadd.f32 %v2828_v35, %v1939_v63  ;;  %1434 = vmatmul.bf16.gmra.mxu1 %v1166_v62  ;;  %v1643_v13 = vmax.f32 %v1396_v3, 0.0 }
 0x29e   : > { %v851_v9 = vpop.f32.mrf.mxu0 }
 0x29f   : > { %2215 = vst.msk [vmem:[%s2837_s12 + $0xf0] sm:$0xff] %vm2184_vm2, %v1940_v0  ;;  %v852_v14 = vadd.f32 %v2952_v32, %v851_v9 }
 0x2a1   : > { %2419 = vmatmul.msk.bf16.gmra.mxu0 %vm480_vm1, %v452_v1  ;;  %v1072_v20 = vmax.f32 %v852_v14, 0.0 }
 0x2a2   : > { %v1397_v4 = vpop.f32.mrf.mxu1 }
 0x2a3   : > { %v1398_v8 = vadd.f32 %v3019_v10, %v1397_v4  ;;  %2431 = vmatmul.msk.bf16.gmra.mxu3 %vm480_vm1, %v464_v61  ;;  %v376_v61 = vld [vmem:[%s2633_s9 + $0x2e8] sm:$0xff] }
 0x2a4   : > { %v1941_v12 = vpop.f32.mrf.mxu2 }
 0x2a5   : > { %v1644_v15 = vmax.f32 %v1398_v8, 0.0  ;;  %v1942_v16 = vadd.f32 %v2828_v35, %v1941_v12  ;;  %v371_v8 = vld [vmem:[%s2633_s9 + $0x2c0] sm:$0xff] }
 0x2a6   : > { %v853_v17 = vpop.f32.mrf.mxu0 }
 0x2a7   : > { %2216 = vst.msk [vmem:[%s2837_s12 + $0xf8] sm:$0xff] %vm2184_vm2, %v1942_v16  ;;  %v854_v18 = vadd.f32 %v2952_v32, %v853_v17  ;;  %v1747_v19 = vpack.c.bf16 %v1644_v15, %v1643_v13  ;;  %v455_v15 = vpack.c.bf16 %v372_v11, %v371_v8 }
 0x2a9   : > { %v1073_v21 = vmax.f32 %v854_v18, 0.0  ;;  %1983 = vmatmul.bf16.gmra.mxu2 %v1747_v19  ;;  %v391_v19 = vld [vmem:[%s2633_s9 + $0x360] sm:$0xff] }
 0x2aa   : > { %v1400_v22 = vpop.f32.mrf.mxu1 }
 0x2ab   : > { %v1167_v25 = vpack.c.bf16 %v1073_v21, %v1072_v20  ;;  %v1401_v29 = vadd.f32 %v3019_v10, %v1400_v22  ;;  %v392_v20 = vld [vmem:[%s2633_s9 + $0x368] sm:$0xff] }
 0x2ac   : > { %v1944_v26 = vpop.f32.mrf.mxu2  ;;  %v465_v22 = vpack.c.bf16 %v392_v20, %v391_v19 }
 0x2ad   : > { %v1945_v27 = vadd.f32 %v2828_v35, %v1944_v26  ;;  %1439 = vmatmul.bf16.gmra.mxu1 %v1167_v25  ;;  %v1645_v39 = vmax.f32 %v1401_v29, 0.0  ;;  %v3134_v26 = vld [vmem:[%s3702_s6] ss:$0 sm:$0xff] }
 0x2ae   : > { %v856_v38 = vpop.f32.mrf.mxu0 }
 0x2af   : > { %2217 = vst.msk [vmem:[%s2837_s12 + $0x100] sm:$0xff] %vm2184_vm2, %v1945_v27  ;;  %v857_v40 = vadd.f32 %v2952_v32, %v856_v38 }
 0x2b1   : > { %2420 = vmatmul.msk.bf16.gmra.mxu0 %vm480_vm1, %v453_v28  ;;  %v1074_v46 = vmax.f32 %v857_v40, 0.0 }
 0x2b2   : > { %v1402_v30 = vpop.f32.mrf.mxu1 }
 0x2b3   : > { %v1403_v34 = vadd.f32 %v3019_v10, %v1402_v30  ;;  %2432 = vmatmul.msk.bf16.gmra.mxu3 %vm480_vm1, %v465_v22  ;;  %v378_v22 = vld [vmem:[%s2633_s9 + $0x2f8] sm:$0xff] }
 0x2b4   : > { %v1946_v37 = vpop.f32.mrf.mxu2 }
 0x2b5   : > { %v1646_v41 = vmax.f32 %v1403_v34, 0.0  ;;  %v1947_v42 = vadd.f32 %v2828_v35, %v1946_v37  ;;  %v373_v34 = vld [vmem:[%s2633_s9 + $0x2d0] sm:$0xff] }
 0x2b6   : > { %v858_v43 = vpop.f32.mrf.mxu0 }
 0x2b7   : > { %2218 = vst.msk [vmem:[%s2837_s12 + $0x108] sm:$0xff] %vm2184_vm2, %v1947_v42  ;;  %v859_v44 = vadd.f32 %v2952_v32, %v858_v43  ;;  %v1748_v45 = vpack.c.bf16 %v1646_v41, %v1645_v39  ;;  %v456_v41 = vpack.c.bf16 %v374_v36, %v373_v34 }
 0x2b9   : > { %v1075_v47 = vmax.f32 %v859_v44, 0.0  ;;  %1988 = vmatmul.bf16.gmra.mxu2 %v1748_v45  ;;  %v393_v45 = vld [vmem:[%s2633_s9 + $0x370] sm:$0xff] }
 0x2ba   : > { %v1405_v48 = vpop.f32.mrf.mxu1 }
 0x2bb   : > { %v1168_v51 = vpack.c.bf16 %v1075_v47, %v1074_v46  ;;  %v1406_v56 = vadd.f32 %v3019_v10, %v1405_v48  ;;  %v394_v46 = vld [vmem:[%s2633_s9 + $0x378] sm:$0xff] }
 0x2bc   : > { %v1949_v52 = vpop.f32.mrf.mxu2  ;;  %v466_v48 = vpack.c.bf16 %v394_v46, %v393_v45 }
 0x2bd   : > { %v1950_v53 = vadd.f32 %v2828_v35, %v1949_v52  ;;  %1444 = vmatmul.bf16.gmra.mxu1 %v1168_v51  ;;  %v1647_v63 = vmax.f32 %v1406_v56, 0.0 }
 0x2be   : > { %v861_v55 = vpop.f32.mrf.mxu0 }
 0x2bf   : > { %2219 = vst.msk [vmem:[%s2837_s12 + $0x110] sm:$0xff] %vm2184_vm2, %v1950_v53  ;;  %v862_v0 = vadd.f32 %v2952_v32, %v861_v55 }
 0x2c1   : > { %2421 = vmatmul.msk.bf16.gmra.mxu0 %vm480_vm1, %v454_v54  ;;  %v1076_v5 = vmax.f32 %v862_v0, 0.0 }
 0x2c2   : > { %v1407_v57 = vpop.f32.mrf.mxu1 }
 0x2c3   : > { %v1408_v60 = vadd.f32 %v3019_v10, %v1407_v57  ;;  %2433 = vmatmul.msk.bf16.gmra.mxu3 %vm480_vm1, %v466_v48  ;;  %v379_v48 = vld [vmem:[%s2633_s9 + $0x300] sm:$0xff] }
 0x2c4   : > { %v1951_v62 = vpop.f32.mrf.mxu2 }
 0x2c5   : > { %v1648_v1 = vmax.f32 %v1408_v60, 0.0  ;;  %v1952_v9 = vadd.f32 %v2828_v35, %v1951_v62  ;;  %v375_v60 = vld [vmem:[%s2633_s9 + $0x2e0] sm:$0xff] }
 0x2c6   : > { %v863_v2 = vpop.f32.mrf.mxu0 }
 0x2c7   : > { %2220 = vst.msk [vmem:[%s2837_s12 + $0x118] sm:$0xff] %vm2184_vm2, %v1952_v9  ;;  %v864_v3 = vadd.f32 %v2952_v32, %v863_v2  ;;  %v1749_v4 = vpack.c.bf16 %v1648_v1, %v1647_v63  ;;  %v457_v1 = vpack.c.bf16 %v376_v61, %v375_v60  ;;  %v399_v61 = vld [vmem:[%s2633_s9 + $0x3a0] sm:$0xff] }
 0x2c9   : > { %v1077_v6 = vmax.f32 %v864_v3, 0.0  ;;  %1993 = vmatmul.bf16.gmra.mxu2 %v1749_v4  ;;  %v395_v4 = vld [vmem:[%s2633_s9 + $0x380] sm:$0xff] }
 0x2ca   : > { %v1410_v7 = vpop.f32.mrf.mxu1 }
 0x2cb   : > { %v1169_v12 = vpack.c.bf16 %v1077_v6, %v1076_v5  ;;  %v1411_v17 = vadd.f32 %v3019_v10, %v1410_v7  ;;  %v396_v5 = vld [vmem:[%s2633_s9 + $0x388] sm:$0xff] }
 0x2cc   : > { %v1954_v13 = vpop.f32.mrf.mxu2  ;;  %v467_v7 = vpack.c.bf16 %v396_v5, %v395_v4 }
 0x2cd   : > { %v1955_v14 = vadd.f32 %v2828_v35, %v1954_v13  ;;  %1449 = vmatmul.bf16.gmra.mxu1 %v1169_v12  ;;  %v1649_v35 = vmax.f32 %v1411_v17, 0.0 }
 0x2ce   : > { %v866_v16 = vpop.f32.mrf.mxu0 }
 0x2cf   : > { %2221 = vst.msk [vmem:[%s2837_s12 + $0x120] sm:$0xff] %vm2184_vm2, %v1955_v14  ;;  %v867_v24 = vadd.f32 %v2952_v32, %v866_v16 }
 0x2d1   : > { %2422 = vmatmul.msk.bf16.gmra.mxu0 %vm480_vm1, %v455_v15  ;;  %v1078_v30 = vmax.f32 %v867_v24, 0.0 }
 0x2d2   : > { %v1412_v18 = vpop.f32.mrf.mxu1 }
 0x2d3   : > { %v1413_v21 = vadd.f32 %v3019_v10, %v1412_v18  ;;  %2434 = vmatmul.msk.bf16.gmra.mxu3 %vm480_vm1, %v467_v7 }
 0x2d4   : > { %v1956_v23 = vpop.f32.mrf.mxu2 }
 0x2d5   : > { %v1650_v25 = vmax.f32 %v1413_v21, 0.0  ;;  %v1957_v27 = vadd.f32 %v3134_v26, %v1956_v23  ;;  %v377_v21 = vld [vmem:[%s2633_s9 + $0x2f0] sm:$0xff] }
 0x2d6   : > { %v868_v28 = vpop.f32.mrf.mxu0 }
 0x2d7   : > { %2222 = vst.msk [vmem:[%s2837_s12 + $0x128] sm:$0xff] %vm2184_vm2, %v1957_v27  ;;  %v869_v38 = vadd.f32 %v2952_v32, %v868_v28  ;;  %v1750_v29 = vpack.c.bf16 %v1650_v25, %v1649_v35  ;;  %v458_v25 = vpack.c.bf16 %v378_v22, %v377_v21 }
 0x2d9   : > { %v1079_v31 = vmax.f32 %v869_v38, 0.0  ;;  %1998 = vmatmul.bf16.gmra.mxu2 %v1750_v29  ;;  %v397_v29 = vld [vmem:[%s2633_s9 + $0x390] sm:$0xff] }
 0x2da   : > { %v1415_v33 = vpop.f32.mrf.mxu1 }
 0x2db   : > { %v1170_v37 = vpack.c.bf16 %v1079_v31, %v1078_v30  ;;  %v1416_v43 = vadd.f32 %v3019_v10, %v1415_v33  ;;  %v398_v30 = vld [vmem:[%s2633_s9 + $0x398] sm:$0xff] }
 0x2dc   : > { %v1959_v39 = vpop.f32.mrf.mxu2  ;;  %v468_v33 = vpack.c.bf16 %v398_v30, %v397_v29 }
 0x2dd   : > { %v1960_v40 = vadd.f32 %v3134_v26, %v1959_v39  ;;  %1454 = vmatmul.bf16.gmra.mxu1 %v1170_v37  ;;  %v1651_v50 = vmax.f32 %v1416_v43, 0.0 }
 0x2de   : > { %v871_v42 = vpop.f32.mrf.mxu0 }
 0x2df   : > { %2223 = vst.msk [vmem:[%s2837_s12 + $0x130] sm:$0xff] %vm2184_vm2, %v1960_v40  ;;  %v872_v51 = vadd.f32 %v2952_v32, %v871_v42 }
 0x2e1   : > { %2423 = vmatmul.msk.bf16.gmra.mxu0 %vm480_vm1, %v456_v41  ;;  %v1080_v57 = vmax.f32 %v872_v51, 0.0 }
 0x2e2   : > { %v1417_v44 = vpop.f32.mrf.mxu1 }
 0x2e3   : > { %v1418_v47 = vadd.f32 %v3019_v10, %v1417_v44  ;;  %2435 = vmatmul.msk.bf16.gmra.mxu3 %vm480_vm1, %v468_v33  ;;  %v931_v44 = vpop.f32.mrf.mxu3 }
 0x2e4   : > { %v1961_v49 = vpop.f32.mrf.mxu2 }
 0x2e5   : > { %v1652_v52 = vmax.f32 %v1418_v47, 0.0  ;;  %v1962_v53 = vadd.f32 %v3134_v26, %v1961_v49  ;;  %v380_v49 = vld [vmem:[%s2633_s9 + $0x308] sm:$0xff] }
 0x2e6   : > { %v873_v54 = vpop.f32.mrf.mxu0 }
 0x2e7   : > { %2224 = vst.msk [vmem:[%s2837_s12 + $0x138] sm:$0xff] %vm2184_vm2, %v1962_v53  ;;  %v874_v55 = vadd.f32 %v2952_v32, %v873_v54  ;;  %v1751_v56 = vpack.c.bf16 %v1652_v52, %v1651_v50  ;;  %v459_v53 = vpack.c.bf16 %v380_v49, %v379_v48  ;;  %v932_v54 = vadd.f32 %v2952_v32, %v931_v44 }
 0x2e9   : > { %v1081_v58 = vmax.f32 %v874_v55, 0.0  ;;  %2003 = vmatmul.bf16.gmra.mxu2 %v1751_v56 }
 0x2ea   : > { %v1420_v59 = vpop.f32.mrf.mxu1 }
 0x2eb   : > { %v1171_v62 = vpack.c.bf16 %v1081_v58, %v1080_v57  ;;  %v1421_v2 = vadd.f32 %v3019_v10, %v1420_v59  ;;  %v933_v57 = vpop.f32.mrf.mxu3  ;;  %v1104_v58 = vmax.f32 %v932_v54, 0.0 }
 0x2ec   : > { %v1964_v63 = vpop.f32.mrf.mxu2  ;;  %v934_v59 = vadd.f32 %v2952_v32, %v933_v57  ;;  %v404_v57 = vld [vmem:[%s2633_s9 + $0x3c8] sm:$0xff] }
 0x2ed   : > { %v1965_v0 = vadd.f32 %v3134_v26, %v1964_v63  ;;  %1459 = vmatmul.bf16.gmra.mxu1 %v1171_v62  ;;  %v1653_v11 = vmax.f32 %v1421_v2, 0.0  ;;  %v400_v62 = vld [vmem:[%s2633_s9 + $0x3a8] sm:$0xff] }
 0x2ee   : > { %v876_v9 = vpop.f32.mrf.mxu0 }
 0x2ef   : > { %2225 = vst.msk [vmem:[%s2837_s12 + $0x140] sm:$0xff] %vm2184_vm2, %v1965_v0  ;;  %v877_v12 = vadd.f32 %v2952_v32, %v876_v9  ;;  %v1105_v0 = vmax.f32 %v934_v59, 0.0 }
 0x2f1   : > { %2424 = vmatmul.msk.bf16.gmra.mxu0 %vm480_vm1, %v457_v1  ;;  %v1082_v18 = vmax.f32 %v877_v12, 0.0  ;;  %v469_v1 = vpack.c.bf16 %v400_v62, %v399_v61 }
 0x2f2   : > { %v1422_v3 = vpop.f32.mrf.mxu1 }
 0x2f3   : > { %v1423_v6 = vadd.f32 %v3019_v10, %v1422_v3  ;;  %2436 = vmatmul.msk.bf16.gmra.mxu3 %vm480_vm1, %v469_v1  ;;  %v936_v12 = vpop.f32.mrf.mxu3 }
 0x2f4   : > { %v1966_v8 = vpop.f32.mrf.mxu2 }
 0x2f5   : > { %v1654_v13 = vmax.f32 %v1423_v6, 0.0  ;;  %v1967_v14 = vadd.f32 %v3134_v26, %v1966_v8  ;;  %v3204_v6 = vpack.c.bf16 %v1105_v0, %v1104_v58 }
 0x2f6   : > { %v878_v15 = vpop.f32.mrf.mxu0 }
 0x2f7   : > { %2226 = vst.msk [vmem:[%s2837_s12 + $0x148] sm:$0xff] %vm2184_vm2, %v1967_v14  ;;  %v879_v16 = vadd.f32 %v2952_v32, %v878_v15  ;;  %v1752_v17 = vpack.c.bf16 %v1654_v13, %v1653_v11 }
 0x2f9   : > { %v1083_v19 = vmax.f32 %v879_v16, 0.0  ;;  %2008 = vmatmul.bf16.gmra.mxu2 %v1752_v17 }
 0x2fa   : > { %v1425_v20 = vpop.f32.mrf.mxu1 }
 0x2fb   : > { %v1172_v23 = vpack.c.bf16 %v1083_v19, %v1082_v18  ;;  %v1426_v28 = vadd.f32 %v3019_v10, %v1425_v20  ;;  %v937_v19 = vadd.f32 %v2952_v32, %v936_v12  ;;  %v938_v22 = vpop.f32.mrf.mxu3 }
 0x2fc   : > { %v1969_v35 = vpop.f32.mrf.mxu2 }
 0x2fd   : > { %v1970_v24 = vadd.f32 %v3134_v26, %v1969_v35  ;;  %1464 = vmatmul.bf16.gmra.mxu1 %v1172_v23  ;;  %v1655_v36 = vmax.f32 %v1426_v28, 0.0  ;;  %v1106_v23 = vmax.f32 %v937_v19, 0.0  ;;  %v939_v35 = vadd.f32 %v2952_v32, %v938_v22  ;;  %v406_v19 = vld [vmem:[%s2633_s9 + $0x3d8] sm:$0xff] }
 0x2fe   : > { %v881_v27 = vpop.f32.mrf.mxu0 }
 0x2ff   : > { %2227 = vst.msk [vmem:[%s2837_s12 + $0x150] sm:$0xff] %vm2184_vm2, %v1970_v24  ;;  %v882_v37 = vadd.f32 %v2952_v32, %v881_v27  ;;  %v402_v27 = vld [vmem:[%s2633_s9 + $0x3b8] sm:$0xff] }
 0x301   : > { %2425 = vmatmul.msk.bf16.gmra.mxu0 %vm480_vm1, %v458_v25  ;;  %v1084_v45 = vmax.f32 %v882_v37, 0.0  ;;  %v401_v25 = vld [vmem:[%s2633_s9 + $0x3b0] sm:$0xff] }
 0x302   : > { %v1427_v38 = vpop.f32.mrf.mxu1  ;;  %v470_v29 = vpack.c.bf16 %v402_v27, %v401_v25 }
 0x303   : > { %v1428_v31 = vadd.f32 %v3019_v10, %v1427_v38  ;;  %v1107_v38 = vmax.f32 %v939_v35, 0.0  ;;  %v3257_v35 = vld [vmem:[%s3698_s2] ss:$0 sm:$0xff] }
 0x304   : > { %v1971_v34 = vpop.f32.mrf.mxu2  ;;  %2437 = vmatmul.msk.bf16.gmra.mxu3 %vm480_vm1, %v470_v29 }
 0x305   : > { %v1656_v39 = vmax.f32 %v1428_v31, 0.0  ;;  %v1972_v40 = vadd.f32 %v3134_v26, %v1971_v34  ;;  %v3221_v37 = vpack.c.bf16 %v1107_v38, %v1106_v23 }
 0x306   : > { %v883_v41 = vpop.f32.mrf.mxu0 }
 0x307   : > { %2228 = vst.msk [vmem:[%s2837_s12 + $0x158] sm:$0xff] %vm2184_vm2, %v1972_v40  ;;  %v884_v42 = vadd.f32 %v2952_v32, %v883_v41  ;;  %v1753_v43 = vpack.c.bf16 %v1656_v39, %v1655_v36 }
 0x309   : > { %v1085_v46 = vmax.f32 %v884_v42, 0.0  ;;  %2013 = vmatmul.bf16.gmra.mxu2 %v1753_v43  ;;  %v941_v42 = vpop.f32.mrf.mxu3 }
 0x30a   : > { %v1430_v47 = vpop.f32.mrf.mxu1  ;;  %v942_v49 = vadd.f32 %v2952_v32, %v941_v42 }
 0x30b   : > { %v1173_v50 = vpack.c.bf16 %v1085_v46, %v1084_v45  ;;  %v1431_v56 = vadd.f32 %v3019_v10, %v1430_v47 }
 0x30c   : > { %v1974_v51 = vpop.f32.mrf.mxu2 }
 0x30d   : > { %v1975_v52 = vadd.f32 %v3134_v26, %v1974_v51  ;;  %1469 = vmatmul.bf16.gmra.mxu1 %v1173_v50  ;;  %v1657_v9 = vmax.f32 %v1431_v56, 0.0  ;;  %v403_v56 = vld [vmem:[%s2633_s9 + $0x3c0] sm:$0xff] }
 0x30e   : > { %v886_v55 = vpop.f32.mrf.mxu0 }
 0x30f   : > { %2229 = vst.msk [vmem:[%s2837_s12 + $0x160] sm:$0xff] %vm2184_vm2, %v1975_v52  ;;  %v887_v3 = vadd.f32 %v2952_v32, %v886_v55 }
 0x311   : > { %2426 = vmatmul.msk.bf16.gmra.mxu0 %vm480_vm1, %v459_v53  ;;  %v1086_v13 = vmax.f32 %v887_v3, 0.0  ;;  %v943_v52 = vpop.f32.mrf.mxu3  ;;  %v1108_v53 = vmax.f32 %v942_v49, 0.0 }
 0x312   : > { %v1432_v60 = vpop.f32.mrf.mxu1  ;;  %v944_v54 = vadd.f32 %v2952_v32, %v943_v52 }
 0x313   : > { %v1433_v63 = vadd.f32 %v3019_v10, %v1432_v60  ;;  %v471_v60 = vpack.c.bf16 %v404_v57, %v403_v56 }
 0x314   : > { %v1976_v2 = vpop.f32.mrf.mxu2  ;;  %v1109_v59 = vmax.f32 %v944_v54, 0.0 }
 0x315   : > { %v1658_v4 = vmax.f32 %v1433_v63, 0.0  ;;  %v1977_v5 = vadd.f32 %v3134_v26, %v1976_v2  ;;  %2438 = vmatmul.msk.bf16.gmra.mxu3 %vm480_vm1, %v471_v60 }
 0x316   : > { %v888_v7 = vpop.f32.mrf.mxu0 }
 0x317   : > { %2230 = vst.msk [vmem:[%s2837_s12 + $0x168] sm:$0xff] %vm2184_vm2, %v1977_v5  ;;  %v889_v8 = vadd.f32 %v2952_v32, %v888_v7  ;;  %v1754_v11 = vpack.c.bf16 %v1658_v4, %v1657_v9  ;;  %v3238_v9 = vpack.c.bf16 %v1109_v59, %v1108_v53 }
 0x319   : > { %v1087_v14 = vmax.f32 %v889_v8, 0.0  ;;  %2018 = vmatmul.bf16.gmra.mxu2 %v1754_v11  ;;  %v3243_v5 = vpop.f32.mrf.mxu3 }
 0x31a   : > { %v1435_v15 = vpop.f32.mrf.mxu1 }
 0x31b   : > { %v1174_v16 = vpack.c.bf16 %v1087_v14, %v1086_v13  ;;  %v1436_v21 = vadd.f32 %v3019_v10, %v1435_v15 }
 0x31c   : > { %v1979_v17 = vpop.f32.mrf.mxu2 }
 0x31d   : > { %v1980_v18 = vadd.f32 %v3134_v26, %v1979_v17  ;;  %1474 = vmatmul.bf16.gmra.mxu1 %v1174_v16  ;;  %v1659_v30 = vmax.f32 %v1436_v21, 0.0 }
 0x31e   : > { %v891_v20 = vpop.f32.mrf.mxu0 }
 0x31f   : > { %2231 = vst.msk [vmem:[%s2837_s12 + $0x170] sm:$0xff] %vm2184_vm2, %v1980_v18  ;;  %v892_v33 = vadd.f32 %v2952_v32, %v891_v20  ;;  %v405_v18 = vld [vmem:[%s2633_s9 + $0x3d0] sm:$0xff] }
 0x320   : > { %v472_v21 = vpack.c.bf16 %v406_v19, %v405_v18 }
 0x321   : > { %v1088_v43 = vmax.f32 %v892_v33, 0.0  ;;  %v3248_v16 = vpop.f32.mrf.mxu3 }
 0x322   : > { %v1437_v24 = vpop.f32.mrf.mxu1 }
 0x323   : > { %v1438_v28 = vadd.f32 %v3019_v10, %v1437_v24 }
 0x324   : > { %v1981_v31 = vpop.f32.mrf.mxu2 }
 0x325   : > { %v1660_v34 = vmax.f32 %v1438_v28, 0.0  ;;  %v1982_v36 = vadd.f32 %v3134_v26, %v1981_v31  ;;  %2439 = vmatmul.msk.bf16.gmra.mxu3 %vm480_vm1, %v472_v21 }
 0x326   : > { %v893_v39 = vpop.f32.mrf.mxu0 }
 0x327   : > { %2232 = vst.msk [vmem:[%s2837_s12 + $0x178] sm:$0xff] %vm2184_vm2, %v1982_v36  ;;  %v894_v40 = vadd.f32 %v2952_v32, %v893_v39  ;;  %v1755_v41 = vpack.c.bf16 %v1660_v34, %v1659_v30 }
 0x329   : > { %v1089_v44 = vmax.f32 %v894_v40, 0.0  ;;  %2023 = vmatmul.bf16.gmra.mxu2 %v1755_v41  ;;  %v3265_v30 = vpop.f32.mrf.mxu3 }
 0x32a   : > { %v1440_v45 = vpop.f32.mrf.mxu1 }
 0x32b   : > { %v1175_v46 = vpack.c.bf16 %v1089_v44, %v1088_v43  ;;  %v1441_v51 = vadd.f32 %v3019_v10, %v1440_v45  ;;  %v407_v45 = vld [vmem:[%s2633_s9 + $0x3e0] sm:$0xff] }
 0x32c   : > { %v1984_v47 = vpop.f32.mrf.mxu2 }
 0x32d   : > { %v1985_v48 = vadd.f32 %v3134_v26, %v1984_v47  ;;  %1479 = vmatmul.bf16.gmra.mxu1 %v1175_v46  ;;  %v1661_v61 = vmax.f32 %v1441_v51, 0.0  ;;  %v408_v46 = vld [vmem:[%s2633_s9 + $0x3e8] sm:$0xff] }
 0x32e   : > { %v896_v50 = vpop.f32.mrf.mxu0 }
 0x32f   : > { %2233 = vst.msk [vmem:[%s2837_s12 + $0x180] sm:$0xff] %vm2184_vm2, %v1985_v48  ;;  %v897_v63 = vadd.f32 %v2952_v32, %v896_v50  ;;  %v473_v48 = vpack.c.bf16 %v408_v46, %v407_v45 }
 0x331   : > { %v1090_v7 = vmax.f32 %v897_v63, 0.0  ;;  %v3270_v42 = vpop.f32.mrf.mxu3 }
 0x332   : > { %v1442_v55 = vpop.f32.mrf.mxu1 }
 0x333   : > { %v1443_v58 = vadd.f32 %v3019_v10, %v1442_v55 }
 0x334   : > { %v1986_v62 = vpop.f32.mrf.mxu2 }
 0x335   : > { %v1662_v0 = vmax.f32 %v1443_v58, 0.0  ;;  %v1987_v1 = vadd.f32 %v3134_v26, %v1986_v62  ;;  %2440 = vmatmul.msk.bf16.gmra.mxu3 %vm480_vm1, %v473_v48 }
 0x336   : > { %v898_v2 = vpop.f32.mrf.mxu0 }
 0x337   : > { %2234 = vst.msk [vmem:[%s2837_s12 + $0x188] sm:$0xff] %vm2184_vm2, %v1987_v1  ;;  %v899_v3 = vadd.f32 %v2952_v32, %v898_v2  ;;  %v1756_v4 = vpack.c.bf16 %v1662_v0, %v1661_v61 }
 0x339   : > { %v1091_v8 = vmax.f32 %v899_v3, 0.0  ;;  %2028 = vmatmul.bf16.gmra.mxu2 %v1756_v4  ;;  %v3282_v60 = vpop.f32.mrf.mxu3  ;;  %v409_v3 = vld [vmem:[%s2633_s9 + $0x3f0] sm:$0xff]  ;;  %v410_v4 = vld [vmem:[%s2633_s9 + $0x3f8] sm:$0xff] }
 0x33a   : > { %v1445_v11 = vpop.f32.mrf.mxu1 }
 0x33b   : > { %v1176_v12 = vpack.c.bf16 %v1091_v8, %v1090_v7  ;;  %v1446_v32 = vadd.f32 %v3019_v10, %v1445_v11  ;;  %v474_v8 = vpack.c.bf16 %v410_v4, %v409_v3 }
 0x33c   : > { %v1989_v13 = vpop.f32.mrf.mxu2 }
 0x33d   : > { %v1990_v14 = vadd.f32 %v3134_v26, %v1989_v13  ;;  %1484 = vmatmul.bf16.gmra.mxu1 %v1176_v12  ;;  %v1663_v23 = vmax.f32 %v1446_v32, 0.0 }
 0x33e   : > { %v901_v15 = vpop.f32.mrf.mxu0 }
 0x33f   : > { %2235 = vst.msk [vmem:[%s2837_s12 + $0x190] sm:$0xff] %vm2184_vm2, %v1990_v14  ;;  %v902_v24 = vadd.f32 %v3257_v35, %v901_v15 }
 0x341   : > { %v1092_v31 = vmax.f32 %v902_v24, 0.0  ;;  %v3291_v12 = vpop.f32.mrf.mxu3 }
 0x342   : > { %v1447_v17 = vpop.f32.mrf.mxu1 }
 0x343   : > { %v1448_v20 = vadd.f32 %v3019_v10, %v1447_v17 }
 0x344   : > { %v1991_v22 = vpop.f32.mrf.mxu2 }
 0x345   : > { %v1664_v25 = vmax.f32 %v1448_v20, 0.0  ;;  %v1992_v27 = vadd.f32 %v3134_v26, %v1991_v22  ;;  %2441 = vmatmul.msk.bf16.gmra.mxu3 %vm480_vm1, %v474_v8 }
 0x346   : > { %v903_v28 = vpop.f32.mrf.mxu0 }
 0x347   : > { %2236 = vst.msk [vmem:[%s2837_s12 + $0x198] sm:$0xff] %vm2184_vm2, %v1992_v27  ;;  %v904_v38 = vadd.f32 %v3257_v35, %v903_v28  ;;  %v1757_v29 = vpack.c.bf16 %v1664_v25, %v1663_v23 }
 0x349   : > { %v1093_v33 = vmax.f32 %v904_v38, 0.0  ;;  %2033 = vmatmul.bf16.gmra.mxu2 %v1757_v29  ;;  %v3300_v28 = vpop.f32.mrf.mxu3 }
 0x34a   : > { %v1450_v34 = vpop.f32.mrf.mxu1 }
 0x34b   : > { %v1177_v36 = vpack.c.bf16 %v1093_v33, %v1092_v31  ;;  %v1451_v43 = vadd.f32 %v3019_v10, %v1450_v34 }
 0x34c   : > { %v1994_v39 = vpop.f32.mrf.mxu2 }
 0x34d   : > { %v1995_v40 = vadd.f32 %v3134_v26, %v1994_v39  ;;  %1489 = vmatmul.bf16.gmra.mxu1 %v1177_v36  ;;  %v1665_v50 = vmax.f32 %v1451_v43, 0.0 }
 0x34e   : > { %v906_v41 = vpop.f32.mrf.mxu0 }
 0x34f   : > { %2237 = vst.msk [vmem:[%s2837_s12 + $0x1a0] sm:$0xff] %vm2184_vm2, %v1995_v40  ;;  %v907_v51 = vadd.f32 %v3257_v35, %v906_v41 }
 0x351   : > { %v1094_v57 = vmax.f32 %v907_v51, 0.0  ;;  %v3311_v45 = vpop.f32.mrf.mxu3 }
 0x352   : > { %v1452_v44 = vpop.f32.mrf.mxu1 }
 0x353   : > { %v1453_v47 = vadd.f32 %v3019_v10, %v1452_v44 }
 0x354   : > { %v1996_v49 = vpop.f32.mrf.mxu2 }
 0x355   : > { %v1666_v52 = vmax.f32 %v1453_v47, 0.0  ;;  %v1997_v53 = vadd.f32 %v3134_v26, %v1996_v49 }
 0x356   : > { %v908_v54 = vpop.f32.mrf.mxu0 }
 0x357   : > { %2238 = vst.msk [vmem:[%s2837_s12 + $0x1a8] sm:$0xff] %vm2184_vm2, %v1997_v53  ;;  %v909_v55 = vadd.f32 %v3257_v35, %v908_v54  ;;  %v1758_v56 = vpack.c.bf16 %v1666_v52, %v1665_v50 }
 0x359   : > { %v1095_v58 = vmax.f32 %v909_v55, 0.0  ;;  %2038 = vmatmul.bf16.gmra.mxu2 %v1758_v56  ;;  %v3317_v55 = vpop.f32.mrf.mxu3 }
 0x35a   : > { %v1455_v59 = vpop.f32.mrf.mxu1 }
 0x35b   : > { %v1178_v61 = vpack.c.bf16 %v1095_v58, %v1094_v57  ;;  %v1456_v1 = vadd.f32 %v3019_v10, %v1455_v59 }
 0x35c   : > { %v1999_v62 = vpop.f32.mrf.mxu2 }
 0x35d   : > { %v2000_v63 = vadd.f32 %v3134_v26, %v1999_v62  ;;  %1494 = vmatmul.bf16.gmra.mxu1 %v1178_v61  ;;  %v1667_v13 = vmax.f32 %v1456_v1, 0.0 }
 0x35e   : > { %v911_v0 = vpop.f32.mrf.mxu0 }
 0x35f   : > { %2239 = vst.msk [vmem:[%s2837_s12 + $0x1b0] sm:$0xff] %vm2184_vm2, %v2000_v63  ;;  %v912_v14 = vadd.f32 %v3257_v35, %v911_v0 }
 0x361   : > { %v1096_v20 = vmax.f32 %v912_v14, 0.0 }
 0x362   : > { %v1457_v2 = vpop.f32.mrf.mxu1 }
 0x363   : > { %v1458_v7 = vadd.f32 %v3019_v10, %v1457_v2 }
 0x364   : > { %v2001_v11 = vpop.f32.mrf.mxu2 }
 0x365   : > { %v1668_v15 = vmax.f32 %v1458_v7, 0.0  ;;  %v2002_v32 = vadd.f32 %v3134_v26, %v2001_v11  ;;  %v3325_v11 = vpop.f32.mrf.mxu3 }
 0x366   : > { %v913_v17 = vpop.f32.mrf.mxu0 }
 0x367   : > { %v1759_v18 = vpack.c.bf16 %v1668_v15, %v1667_v13  ;;  %2240 = vst.msk [vmem:[%s2837_s12 + $0x1b8] sm:$0xff] %vm2184_vm2, %v2002_v32  ;;  %v914_v19 = vadd.f32 %v3257_v35, %v913_v17  ;;  %v3334_v17 = vld [vmem:[%s3700_s4] ss:$0 sm:$0xff] }
 0x369   : > { %v1097_v21 = vmax.f32 %v914_v19, 0.0  ;;  %2043 = vmatmul.bf16.gmra.mxu2 %v1759_v18 }
 0x36a   : > { %v1460_v22 = vpop.f32.mrf.mxu1 }
 0x36b   : > { %v1179_v23 = vpack.c.bf16 %v1097_v21, %v1096_v20  ;;  %v1461_v38 = vadd.f32 %v3019_v10, %v1460_v22 }
 0x36c   : > { %v2004_v24 = vpop.f32.mrf.mxu2 }
 0x36d   : > { %v2005_v25 = vadd.f32 %v3134_v26, %v2004_v24  ;;  %1499 = vmatmul.bf16.gmra.mxu1 %v1179_v23  ;;  %v1669_v34 = vmax.f32 %v1461_v38, 0.0 }
 0x36e   : > { %v916_v27 = vpop.f32.mrf.mxu0 }
 0x36f   : > { %2241 = vst.msk [vmem:[%s2837_s12 + $0x1c0] sm:$0xff] %vm2184_vm2, %v2005_v25  ;;  %v917_v36 = vadd.f32 %v3257_v35, %v916_v27  ;;  %v3339_v25 = vpop.f32.mrf.mxu3 }
 0x371   : > { %v1098_v46 = vmax.f32 %v917_v36, 0.0 }
 0x372   : > { %v1462_v29 = vpop.f32.mrf.mxu1 }
 0x373   : > { %v1463_v31 = vadd.f32 %v3019_v10, %v1462_v29 }
 0x374   : > { %v2006_v33 = vpop.f32.mrf.mxu2 }
 0x375   : > { %v1670_v39 = vmax.f32 %v1463_v31, 0.0  ;;  %v2007_v40 = vadd.f32 %v3134_v26, %v2006_v33 }
 0x376   : > { %v918_v41 = vpop.f32.mrf.mxu0 }
 0x377   : > { %v1760_v43 = vpack.c.bf16 %v1670_v39, %v1669_v34  ;;  %2242 = vst.msk [vmem:[%s2837_s12 + $0x1c8] sm:$0xff] %vm2184_vm2, %v2007_v40  ;;  %v919_v44 = vadd.f32 %v3257_v35, %v918_v41  ;;  %v3347_v39 = vpop.f32.mrf.mxu3 }
 0x379   : > { %v1099_v47 = vmax.f32 %v919_v44, 0.0  ;;  %2048 = vmatmul.bf16.gmra.mxu2 %v1760_v43 }
 0x37a   : > { %v1465_v48 = vpop.f32.mrf.mxu1 }
 0x37b   : > { %v1180_v49 = vpack.c.bf16 %v1099_v47, %v1098_v46  ;;  %v1466_v53 = vadd.f32 %v3019_v10, %v1465_v48 }
 0x37c   : > { %v2009_v50 = vpop.f32.mrf.mxu2 }
 0x37d   : > { %v2010_v51 = vadd.f32 %v3134_v26, %v2009_v50  ;;  %1504 = vmatmul.bf16.gmra.mxu1 %v1180_v49  ;;  %v1671_v58 = vmax.f32 %v1466_v53, 0.0 }
 0x37e   : > { %v921_v52 = vpop.f32.mrf.mxu0 }
 0x37f   : > { %2243 = vst.msk [vmem:[%s2837_s12 + $0x1d0] sm:$0xff] %vm2184_vm2, %v2010_v51  ;;  %v922_v59 = vadd.f32 %v3257_v35, %v921_v52  ;;  %v3354_v51 = vpop.f32.mrf.mxu3 }
 0x381   : > { %v1100_v2 = vmax.f32 %v922_v59, 0.0 }
 0x382   : > { %v1467_v54 = vpop.f32.mrf.mxu1 }
 0x383   : > { %v1468_v56 = vadd.f32 %v3019_v10, %v1467_v54 }
 0x384   : > { %v2011_v57 = vpop.f32.mrf.mxu2 }
 0x385   : > { %v1672_v61 = vmax.f32 %v1468_v56, 0.0  ;;  %v2012_v62 = vadd.f32 %v3134_v26, %v2011_v57 }
 0x386   : > { %v923_v63 = vpop.f32.mrf.mxu0 }
 0x387   : > { %v1761_v0 = vpack.c.bf16 %v1672_v61, %v1671_v58  ;;  %2244 = vst.msk [vmem:[%s2837_s12 + $0x1d8] sm:$0xff] %vm2184_vm2, %v2012_v62  ;;  %v924_v1 = vadd.f32 %v3257_v35, %v923_v63  ;;  %v3362_v59 = vpop.f32.mrf.mxu3 }
 0x389   : > { %v1101_v3 = vmax.f32 %v924_v1, 0.0  ;;  %2053 = vmatmul.bf16.gmra.mxu2 %v1761_v0 }
 0x38a   : > { %v1470_v4 = vpop.f32.mrf.mxu1 }
 0x38b   : > { %v1181_v7 = vpack.c.bf16 %v1101_v3, %v1100_v2  ;;  %v1471_v15 = vadd.f32 %v3019_v10, %v1470_v4 }
 0x38c   : > { %v2014_v8 = vpop.f32.mrf.mxu2 }
 0x38d   : > { %v2015_v13 = vadd.f32 %v3134_v26, %v2014_v8  ;;  %1509 = vmatmul.bf16.gmra.mxu1 %v1181_v7  ;;  %v1673_v20 = vmax.f32 %v1471_v15, 0.0 }
 0x38e   : > { %v926_v14 = vpop.f32.mrf.mxu0 }
 0x38f   : > { %2245 = vst.msk [vmem:[%s2837_s12 + $0x1e0] sm:$0xff] %vm2184_vm2, %v2015_v13  ;;  %v927_v21 = vadd.f32 %v3257_v35, %v926_v14  ;;  %v3369_v3 = vpop.f32.mrf.mxu3 }
 0x391   : > { %v1102_v38 = vmax.f32 %v927_v21, 0.0 }
 0x392   : > { %v1472_v32 = vpop.f32.mrf.mxu1 }
 0x393   : > { %v1473_v18 = vadd.f32 %v3334_v17, %v1472_v32 }
 0x394   : > { %v2016_v19 = vpop.f32.mrf.mxu2 }
 0x395   : > { %v1674_v22 = vmax.f32 %v1473_v18, 0.0  ;;  %v2017_v23 = vadd.f32 %v3134_v26, %v2016_v19 }
 0x396   : > { %v928_v24 = vpop.f32.mrf.mxu0 }
 0x397   : > { %v1762_v10 = vpack.c.bf16 %v1674_v22, %v1673_v20  ;;  %2246 = vst.msk [vmem:[%s2837_s12 + $0x1e8] sm:$0xff] %vm2184_vm2, %v2017_v23  ;;  %v929_v27 = vadd.f32 %v3257_v35, %v928_v24  ;;  %v3378_v19 = vpop.f32.mrf.mxu3 }
 0x399   : > { %v1103_v29 = vmax.f32 %v929_v27, 0.0  ;;  %2058 = vmatmul.bf16.gmra.mxu2 %v1762_v10  ;;  %v947_v10 = vadd.f32 %v3257_v35, %v3243_v5  ;;  %v949_v27 = vadd.f32 %v3257_v35, %v3248_v16 }
 0x39a   : > { %v1475_v31 = vpop.f32.mrf.mxu1 }
 0x39b   : > { %v1182_v33 = vpack.c.bf16 %v1103_v29, %v1102_v38  ;;  %v1476_v40 = vadd.f32 %v3334_v17, %v1475_v31 }
 0x39c   : > { %v2019_v34 = vpop.f32.mrf.mxu2 }
 0x39d   : > { %v2020_v36 = vadd.f32 %v3134_v26, %v2019_v34  ;;  %1514 = vmatmul.bf16.vlgmr.msrb.gmra.mxu3 %v1182_v33  ;;  %v1675_v46 = vmax.f32 %v1476_v40, 0.0  ;;  %v1110_v34 = vmax.f32 %v947_v10, 0.0 }
 0x39f   : > { %2247 = vst.msk [vmem:[%s2837_s12 + $0x1f0] sm:$0xff] %vm2184_vm2, %v2020_v36  ;;  %v3385_v24 = vpop.f32.mrf.mxu3  ;;  %v1111_v36 = vmax.f32 %v949_v27, 0.0 }
 0x3a2   : > { %v1477_v41 = vpop.f32.mrf.mxu1 }
 0x3a3   : > { %v1478_v43 = vadd.f32 %v3334_v17, %v1477_v41 }
 0x3a4   : > { %v2021_v44 = vpop.f32.mrf.mxu2 }
 0x3a5   : > { %v1676_v47 = vmax.f32 %v1478_v43, 0.0  ;;  %v2022_v48 = vadd.f32 %v3134_v26, %v2021_v44  ;;  %v1186_v43 = vpack.c.bf16 %v1111_v36, %v1110_v34 }
 0x3a7   : > { %v1763_v49 = vpack.c.bf16 %v1676_v47, %v1675_v46  ;;  %2248 = vst.msk [vmem:[%s2837_s12 + $0x1f8] sm:$0xff] %vm2184_vm2, %v2022_v48  ;;  %v3395_v44 = vpop.f32.mrf.mxu3  ;;  %v952_v48 = vadd.f32 %v3257_v35, %v3265_v30 }
 0x3a9   : > { %2063 = vmatmul.bf16.gmra.mxu2 %v1763_v49  ;;  %v954_v49 = vadd.f32 %v3257_v35, %v3270_v42 }
 0x3aa   : > { %v1480_v50 = vpop.f32.mrf.mxu1 }
 0x3ab   : > { %v1481_v54 = vadd.f32 %v3334_v17, %v1480_v50 }
 0x3ac   : > { %v2024_v52 = vpop.f32.mrf.mxu2 }
 0x3ad   : > { %v2025_v53 = vadd.f32 %v3134_v26, %v2024_v52  ;;  %1519 = vmatmul.bf16.gmra.mxu3 %v3204_v6  ;;  %v1677_v61 = vmax.f32 %v1481_v54, 0.0 }
 0x3af   : > { %2249 = vst.msk [vmem:[%s2837_s12 + $0x200] sm:$0xff] %vm2184_vm2, %v2025_v53 }
 0x3b2   : > { %v1482_v56 = vpop.f32.mrf.mxu1 }
 0x3b3   : > { %v1483_v57 = vadd.f32 %v3334_v17, %v1482_v56 }
 0x3b4   : > { %v2026_v58 = vpop.f32.mrf.mxu2 }
 0x3b5   : > { %v1678_v62 = vmax.f32 %v1483_v57, 0.0  ;;  %v2027_v63 = vadd.f32 %v3134_v26, %v2026_v58  ;;  %v3407_v57 = vpop.f32.mrf.mxu3  ;;  %v1112_v58 = vmax.f32 %v952_v48, 0.0 }
 0x3b7   : > { %v1764_v0 = vpack.c.bf16 %v1678_v62, %v1677_v61  ;;  %2250 = vst.msk [vmem:[%s2837_s12 + $0x208] sm:$0xff] %vm2184_vm2, %v2027_v63  ;;  %v1113_v61 = vmax.f32 %v954_v49, 0.0 }
 0x3b9   : > { %2068 = vmatmul.bf16.gmra.mxu2 %v1764_v0  ;;  %v1187_v63 = vpack.c.bf16 %v1113_v61, %v1112_v58 }
 0x3ba   : > { %v1485_v6 = vpop.f32.mrf.mxu1 }
 0x3bb   : > { %v1486_v4 = vadd.f32 %v3334_v17, %v1485_v6 }
 0x3bc   : > { %v2029_v1 = vpop.f32.mrf.mxu2 }
 0x3bd   : > { %v2030_v2 = vadd.f32 %v3134_v26, %v2029_v1  ;;  %1524 = vmatmul.bf16.gmra.mxu3 %v3221_v37  ;;  %v1679_v14 = vmax.f32 %v1486_v4, 0.0  ;;  %v3414_v6 = vpop.f32.mrf.mxu3  ;;  %v957_v4 = vadd.f32 %v3257_v35, %v3282_v60 }
 0x3bf   : > { %2251 = vst.msk [vmem:[%s2837_s12 + $0x210] sm:$0xff] %vm2184_vm2, %v2030_v2 }
 0x3c2   : > { %v1487_v7 = vpop.f32.mrf.mxu1 }
 0x3c3   : > { %v1488_v8 = vadd.f32 %v3334_v17, %v1487_v7  ;;  %v959_v7 = vadd.f32 %v3257_v35, %v3291_v12 }
 0x3c4   : > { %v2031_v13 = vpop.f32.mrf.mxu2 }
 0x3c5   : > { %v1680_v15 = vmax.f32 %v1488_v8, 0.0  ;;  %v2032_v32 = vadd.f32 %v3134_v26, %v2031_v13 }
 0x3c7   : > { %v1765_v18 = vpack.c.bf16 %v1680_v15, %v1679_v14  ;;  %2252 = vst.msk [vmem:[%s2837_s12 + $0x218] sm:$0xff] %vm2184_vm2, %v2032_v32 }
 0x3c9   : > { %2073 = vmatmul.bf16.gmra.mxu2 %v1765_v18  ;;  %v1114_v18 = vmax.f32 %v957_v4, 0.0  ;;  %v974_v4 = vadd.f32 %v3257_v35, %v3347_v39 }
 0x3ca   : > { %v1490_v37 = vpop.f32.mrf.mxu1 }
 0x3cb   : > { %v1491_v22 = vadd.f32 %v3334_v17, %v1490_v37  ;;  %v1115_v37 = vmax.f32 %v959_v7, 0.0 }
 0x3cc   : > { %v2034_v20 = vpop.f32.mrf.mxu2 }
 0x3cd   : > { %v2035_v21 = vadd.f32 %v3134_v26, %v2034_v20  ;;  %1529 = vmatmul.bf16.gmra.mxu3 %v3238_v9  ;;  %v1681_v31 = vmax.f32 %v1491_v22, 0.0  ;;  %v1188_v22 = vpack.c.bf16 %v1115_v37, %v1114_v18 }
 0x3cf   : > { %2253 = vst.msk [vmem:[%s2837_s12 + $0x220] sm:$0xff] %vm2184_vm2, %v2035_v21  ;;  %v3425_v21 = vpop.f32.mrf.mxu3 }
 0x3d2   : > { %v1492_v23 = vpop.f32.mrf.mxu1 }
 0x3d3   : > { %v1493_v38 = vadd.f32 %v3334_v17, %v1492_v23 }
 0x3d4   : > { %v2036_v29 = vpop.f32.mrf.mxu2 }
 0x3d5   : > { %v1682_v33 = vmax.f32 %v1493_v38, 0.0  ;;  %v2037_v9 = vadd.f32 %v3134_v26, %v2036_v29  ;;  %v962_v38 = vadd.f32 %v3257_v35, %v3300_v28  ;;  %v964_v29 = vadd.f32 %v3257_v35, %v3311_v45 }
 0x3d7   : > { %v1766_v40 = vpack.c.bf16 %v1682_v33, %v1681_v31  ;;  %2254 = vst.msk [vmem:[%s2837_s12 + $0x228] sm:$0xff] %vm2184_vm2, %v2037_v9  ;;  %v3436_v33 = vpop.f32.mrf.mxu3 }
 0x3d9   : > { %2078 = vmatmul.bf16.gmra.mxu2 %v1766_v40 }
 0x3da   : > { %v1495_v41 = vpop.f32.mrf.mxu1 }
 0x3db   : > { %v1496_v46 = vadd.f32 %v3334_v17, %v1495_v41  ;;  %v1116_v41 = vmax.f32 %v962_v38, 0.0 }
 0x3dc   : > { %v2039_v5 = vpop.f32.mrf.mxu2 }
 0x3dd   : > { %v2040_v16 = vadd.f32 %v3134_v26, %v2039_v5  ;;  %1534 = vmatmul.bf16.gmra.mxu3 %v1186_v43  ;;  %v1683_v53 = vmax.f32 %v1496_v46, 0.0  ;;  %v1117_v43 = vmax.f32 %v964_v29, 0.0 }
 0x3df   : > { %2255 = vst.msk [vmem:[%s2837_s12 + $0x230] sm:$0xff] %vm2184_vm2, %v2040_v16  ;;  %v1189_v16 = vpack.c.bf16 %v1117_v43, %v1116_v41 }
 0x3e2   : > { %v1497_v47 = vpop.f32.mrf.mxu1 }
 0x3e3   : > { %v1498_v50 = vadd.f32 %v3334_v17, %v1497_v47  ;;  %v3442_v47 = vpop.f32.mrf.mxu3 }
 0x3e4   : > { %v2041_v52 = vpop.f32.mrf.mxu2 }
 0x3e5   : > { %v1684_v54 = vmax.f32 %v1498_v50, 0.0  ;;  %v2042_v56 = vadd.f32 %v3134_v26, %v2041_v52  ;;  %v967_v50 = vadd.f32 %v3257_v35, %v3317_v55  ;;  %v969_v52 = vadd.f32 %v3257_v35, %v3325_v11  ;;  %v3460_v11 = vld [vmem:[%s3702_s6] ss:$0 sm:$0xff] }
 0x3e7   : > { %v1767_v62 = vpack.c.bf16 %v1684_v54, %v1683_v53  ;;  %2256 = vst.msk [vmem:[%s2837_s12 + $0x238] sm:$0xff] %vm2184_vm2, %v2042_v56 }
 0x3e9   : > { %2083 = vmatmul.bf16.gmra.mxu2 %v1767_v62  ;;  %v1118_v62 = vmax.f32 %v967_v50, 0.0 }
 0x3ea   : > { %v1500_v30 = vpop.f32.mrf.mxu1 }
 0x3eb   : > { %v1501_v1 = vadd.f32 %v3334_v17, %v1500_v30  ;;  %v1119_v30 = vmax.f32 %v969_v52, 0.0 }
 0x3ec   : > { %v2044_v0 = vpop.f32.mrf.mxu2 }
 0x3ed   : > { %v2045_v42 = vadd.f32 %v3134_v26, %v2044_v0  ;;  %1539 = vmatmul.bf16.gmra.mxu3 %v1187_v63  ;;  %v1685_v14 = vmax.f32 %v1501_v1, 0.0  ;;  %v3455_v0 = vpop.f32.mrf.mxu3  ;;  %v1190_v55 = vpack.c.bf16 %v1119_v30, %v1118_v62 }
 0x3ef   : > { %2257 = vst.msk [vmem:[%s2837_s12 + $0x240] sm:$0xff] %vm2184_vm2, %v2045_v42 }
 0x3f2   : > { %v1502_v2 = vpop.f32.mrf.mxu1 }
 0x3f3   : > { %v1503_v8 = vadd.f32 %v3334_v17, %v1502_v2  ;;  %v972_v2 = vadd.f32 %v3257_v35, %v3339_v25 }
 0x3f4   : > { %v2046_v13 = vpop.f32.mrf.mxu2 }
 0x3f5   : > { %v1686_v15 = vmax.f32 %v1503_v8, 0.0  ;;  %v2047_v32 = vadd.f32 %v3134_v26, %v2046_v13  ;;  %v1120_v13 = vmax.f32 %v972_v2, 0.0 }
 0x3f7   : > { %v1768_v20 = vpack.c.bf16 %v1686_v15, %v1685_v14  ;;  %2258 = vst.msk [vmem:[%s2837_s12 + $0x248] sm:$0xff] %vm2184_vm2, %v2047_v32  ;;  %v1121_v14 = vmax.f32 %v974_v4, 0.0 }
 0x3f9   : > { %2088 = vmatmul.bf16.gmra.mxu2 %v1768_v20  ;;  %v1191_v25 = vpack.c.bf16 %v1121_v14, %v1120_v13 }
 0x3fa   : > { %v1505_v60 = vpop.f32.mrf.mxu1 }
 0x3fb   : > { %v1506_v10 = vadd.f32 %v3334_v17, %v1505_v60 }
 0x3fc   : > { %v2049_v23 = vpop.f32.mrf.mxu2 }
 0x3fd   : > { %v2050_v12 = vadd.f32 %v3134_v26, %v2049_v23  ;;  %1544 = vmatmul.bf16.gmra.mxu3 %v1188_v22  ;;  %v1687_v34 = vmax.f32 %v1506_v10, 0.0  ;;  %v979_v10 = vadd.f32 %v3257_v35, %v3362_v59 }
 0x3ff   : > { %2259 = vst.msk [vmem:[%s2837_s12 + $0x250] sm:$0xff] %vm2184_vm2, %v2050_v12  ;;  %v977_v12 = vadd.f32 %v3257_v35, %v3354_v51 }
 0x401   : > { %v1122_v29 = vmax.f32 %v977_v12, 0.0 }
 0x402   : > { %v1507_v27 = vpop.f32.mrf.mxu1 }
 0x403   : > { %v1508_v31 = vadd.f32 %v3334_v17, %v1507_v27 }
 0x404   : > { %v2051_v9 = vpop.f32.mrf.mxu2 }
 0x405   : > { %v1688_v36 = vmax.f32 %v1508_v31, 0.0  ;;  %v2052_v40 = vadd.f32 %v3134_v26, %v2051_v9  ;;  %v1123_v31 = vmax.f32 %v979_v10, 0.0 }
 0x407   : > { %v1769_v5 = vpack.c.bf16 %v1688_v36, %v1687_v34  ;;  %2260 = vst.msk [vmem:[%s2837_s12 + $0x258] sm:$0xff] %vm2184_vm2, %v2052_v40  ;;  %v1192_v51 = vpack.c.bf16 %v1123_v31, %v1122_v29 }
 0x409   : > { %2093 = vmatmul.bf16.gmra.mxu2 %v1769_v5 }
 0x40a   : > { %v1510_v28 = vpop.f32.mrf.mxu1 }
 0x40b   : > { %v1511_v48 = vadd.f32 %v3334_v17, %v1510_v28 }
 0x40c   : > { %v2054_v46 = vpop.f32.mrf.mxu2 }
 0x40d   : > { %v2055_v45 = vadd.f32 %v3134_v26, %v2054_v46  ;;  %1549 = vmatmul.bf16.gmra.mxu3 %v1189_v16  ;;  %v1689_v56 = vmax.f32 %v1511_v48, 0.0  ;;  %v982_v16 = vadd.f32 %v3257_v35, %v3369_v3  ;;  %v984_v46 = vadd.f32 %v3257_v35, %v3378_v19 }
 0x40f   : > { %2261 = vst.msk [vmem:[%s2837_s12 + $0x260] sm:$0xff] %vm2184_vm2, %v2055_v45  ;;  %v1125_v50 = vmax.f32 %v984_v46, 0.0 }
 0x412   : > { %v1512_v49 = vpop.f32.mrf.mxu1 }
 0x413   : > { %v1513_v53 = vadd.f32 %v3334_v17, %v1512_v49  ;;  %v1124_v49 = vmax.f32 %v982_v16, 0.0 }
 0x414   : > { %v2056_v54 = vpop.f32.mrf.mxu2 }
 0x415   : > { %v1690_v58 = vmax.f32 %v1513_v53, 0.0  ;;  %v2057_v61 = vadd.f32 %v3134_v26, %v2056_v54  ;;  %v1193_v3 = vpack.c.bf16 %v1125_v50, %v1124_v49 }
 0x417   : > { %v1770_v63 = vpack.c.bf16 %v1690_v58, %v1689_v56  ;;  %2262 = vst.msk [vmem:[%s2837_s12 + $0x268] sm:$0xff] %vm2184_vm2, %v2057_v61 }
 0x419   : > { %2098 = vmatmul.bf16.gmra.mxu2 %v1770_v63  ;;  %v987_v63 = vadd.f32 %v3257_v35, %v3385_v24 }
 0x41c   : > { %v2059_v42 = vpop.f32.mrf.mxu2 }
 0x41d   : > { %v2060_v1 = vadd.f32 %v3460_v11, %v2059_v42  ;;  %1554 = vmatmul.bf16.gmra.mxu3 %v1190_v55  ;;  %v989_v55 = vadd.f32 %v3257_v35, %v3395_v44 }
 0x41f   : > { %2263 = vst.msk [vmem:[%s2837_s12 + $0x270] sm:$0xff] %vm2184_vm2, %v2060_v1  ;;  %v1127_v2 = vmax.f32 %v989_v55, 0.0 }
 0x420   : > { %v1515_v26 = vpop.f32.mrf.mxu3 }
 0x421   : > { %v1516_v15 = vadd.f32 %v3334_v17, %v1515_v26  ;;  %v1126_v26 = vmax.f32 %v987_v63, 0.0 }
 0x423   : > { %v1691_v37 = vmax.f32 %v1516_v15, 0.0  ;;  %v1194_v24 = vpack.c.bf16 %v1127_v2, %v1126_v26 }
 0x424   : > { %v2061_v7 = vpop.f32.mrf.mxu2 }
 0x425   : > { %v2062_v8 = vadd.f32 %v3460_v11, %v2061_v7 }
 0x427   : > { %2264 = vst.msk [vmem:[%s2837_s12 + $0x278] sm:$0xff] %vm2184_vm2, %v2062_v8 }
 0x428   : > { %v1517_v32 = vpop.f32.mrf.mxu3 }
 0x429   : > { %v1518_v18 = vadd.f32 %v3334_v17, %v1517_v32 }
 0x42b   : > { %v1692_v20 = vmax.f32 %v1518_v18, 0.0 }
 0x42c   : > { %v2064_v60 = vpop.f32.mrf.mxu2 }
 0x42d   : > { %v3474_v22 = vpack.c.bf16 %v1692_v20, %v1691_v37  ;;  %v2065_v39 = vadd.f32 %v3460_v11, %v2064_v60  ;;  %1559 = vmatmul.bf16.gmra.mxu3 %v1191_v25  ;;  %v992_v37 = vadd.f32 %v3257_v35, %v3407_v57  ;;  %v994_v20 = vadd.f32 %v3257_v35, %v3414_v6 }
 0x42f   : > { %2265 = vst.msk [vmem:[%s2837_s12 + $0x280] sm:$0xff] %vm2184_vm2, %v2065_v39  ;;  %v1128_v39 = vmax.f32 %v992_v37, 0.0 }
 0x430   : > { %v1520_v23 = vpop.f32.mrf.mxu3 }
 0x431   : > { %v1521_v9 = vadd.f32 %v3334_v17, %v1520_v23  ;;  %v1129_v23 = vmax.f32 %v994_v20, 0.0 }
 0x433   : > { %v1693_v40 = vmax.f32 %v1521_v9, 0.0  ;;  %v1195_v57 = vpack.c.bf16 %v1129_v23, %v1128_v39 }
 0x434   : > { %v2066_v27 = vpop.f32.mrf.mxu2 }
 0x435   : > { %v2067_v38 = vadd.f32 %v3460_v11, %v2066_v27 }
 0x437   : > { %2266 = vst.msk [vmem:[%s2837_s12 + $0x288] sm:$0xff] %vm2184_vm2, %v2067_v38 }
 0x438   : > { %v1522_v34 = vpop.f32.mrf.mxu3 }
 0x439   : > { %v1523_v36 = vadd.f32 %v3334_v17, %v1522_v34 }
 0x43b   : > { %v1694_v41 = vmax.f32 %v1523_v36, 0.0  ;;  %v997_v36 = vadd.f32 %v3257_v35, %v3425_v21 }
 0x43c   : > { %v2069_v43 = vpop.f32.mrf.mxu2 }
 0x43d   : > { %v2070_v59 = vadd.f32 %v3460_v11, %v2069_v43  ;;  %1564 = vmatmul.bf16.gmra.mxu3 %v1192_v51  ;;  %v3489_v5 = vpack.c.bf16 %v1694_v41, %v1693_v40  ;;  %v999_v40 = vadd.f32 %v3257_v35, %v3436_v33  ;;  %v1130_v43 = vmax.f32 %v997_v36, 0.0 }
 0x43f   : > { %2267 = vst.msk [vmem:[%s2837_s12 + $0x290] sm:$0xff] %vm2184_vm2, %v2070_v59  ;;  %v1131_v59 = vmax.f32 %v999_v40, 0.0 }
 0x440   : > { %v1525_v28 = vpop.f32.mrf.mxu3 }
 0x441   : > { %v1526_v52 = vadd.f32 %v3334_v17, %v1525_v28  ;;  %v1196_v21 = vpack.c.bf16 %v1131_v59, %v1130_v43 }
 0x443   : > { %v1695_v56 = vmax.f32 %v1526_v52, 0.0 }
 0x444   : > { %v2071_v45 = vpop.f32.mrf.mxu2 }
 0x445   : > { %v2072_v48 = vadd.f32 %v3460_v11, %v2071_v45 }
 0x447   : > { %2268 = vst.msk [vmem:[%s2837_s12 + $0x298] sm:$0xff] %vm2184_vm2, %v2072_v48 }
 0x448   : > { %v1527_v53 = vpop.f32.mrf.mxu3 }
 0x449   : > { %v1528_v54 = vadd.f32 %v3334_v17, %v1527_v53  ;;  %v1002_v53 = vadd.f32 %v3257_v35, %v3442_v47 }
 0x44b   : > { %v1696_v58 = vmax.f32 %v1528_v54, 0.0  ;;  %v1004_v54 = vadd.f32 %v3257_v35, %v3455_v0 }
 0x44c   : > { %v2074_v61 = vpop.f32.mrf.mxu2 }
 0x44d   : > { %v2075_v19 = vadd.f32 %v3460_v11, %v2074_v61  ;;  %1569 = vmatmul.bf16.gmra.mxu3 %v1193_v3  ;;  %v3503_v62 = vpack.c.bf16 %v1696_v58, %v1695_v56  ;;  %v1132_v3 = vmax.f32 %v1002_v53, 0.0  ;;  %v1133_v61 = vmax.f32 %v1004_v54, 0.0 }
 0x44f   : > { %2269 = vst.msk [vmem:[%s2837_s12 + $0x2a0] sm:$0xff] %vm2184_vm2, %v2075_v19  ;;  %v1197_v47 = vpack.c.bf16 %v1133_v61, %v1132_v3 }
 0x450   : > { %v1530_v30 = vpop.f32.mrf.mxu3 }
 0x451   : > { %v1531_v4 = vadd.f32 %v3334_v17, %v1530_v30 }
 0x453   : > { %v1697_v13 = vmax.f32 %v1531_v4, 0.0 }
 0x454   : > { %v2076_v42 = vpop.f32.mrf.mxu2 }
 0x455   : > { %v2077_v1 = vadd.f32 %v3460_v11, %v2076_v42 }
 0x457   : > { %2270 = vst.msk [vmem:[%s2837_s12 + $0x2a8] sm:$0xff] %vm2184_vm2, %v2077_v1 }
 0x458   : > { %v1532_v7 = vpop.f32.mrf.mxu3 }
 0x459   : > { %v1533_v8 = vadd.f32 %v3334_v17, %v1532_v7 }
 0x45b   : > { %v1698_v14 = vmax.f32 %v1533_v8, 0.0 }
 0x45c   : > { %v2079_v15 = vpop.f32.mrf.mxu2 }
 0x45d   : > { %v2080_v44 = vadd.f32 %v3460_v11, %v2079_v15  ;;  %1574 = vmatmul.bf16.gmra.mxu3 %v1194_v24  ;;  %v3517_v32 = vpack.c.bf16 %v1698_v14, %v1697_v13 }
 0x45f   : > { %2271 = vst.msk [vmem:[%s2837_s12 + $0x2b0] sm:$0xff] %vm2184_vm2, %v2080_v44 }
 0x460   : > { %v1535_v18 = vpop.f32.mrf.mxu3 }
 0x461   : > { %v1536_v12 = vadd.f32 %v3334_v17, %v1535_v18 }
 0x463   : > { %v1699_v38 = vmax.f32 %v1536_v12, 0.0 }
 0x464   : > { %v2081_v25 = vpop.f32.mrf.mxu2 }
 0x465   : > { %v2082_v60 = vadd.f32 %v3460_v11, %v2081_v25 }
 0x467   : > { %2272 = vst.msk [vmem:[%s2837_s12 + $0x2b8] sm:$0xff] %vm2184_vm2, %v2082_v60 }
 0x468   : > { %v1537_v10 = vpop.f32.mrf.mxu3 }
 0x469   : > { %v1538_v27 = vadd.f32 %v3334_v17, %v1537_v10 }
 0x46b   : > { %v1700_v29 = vmax.f32 %v1538_v27, 0.0 }
 0x46c   : > { %v2084_v31 = vpop.f32.mrf.mxu2 }
 0x46d   : > { %v2085_v6 = vadd.f32 %v3460_v11, %v2084_v31  ;;  %1579 = vmatmul.bf16.gmra.mxu3 %v1195_v57  ;;  %v3531_v9 = vpack.c.bf16 %v1700_v29, %v1699_v38 }
 0x46f   : > { %2273 = vst.msk [vmem:[%s2837_s12 + $0x2c0] sm:$0xff] %vm2184_vm2, %v2085_v6 }
 0x470   : > { %v1540_v34 = vpop.f32.mrf.mxu3 }
 0x471   : > { %v1541_v28 = vadd.f32 %v3334_v17, %v1540_v34 }
 0x473   : > { %v1701_v45 = vmax.f32 %v1541_v28, 0.0 }
 0x474   : > { %v2086_v41 = vpop.f32.mrf.mxu2 }
 0x475   : > { %v2087_v51 = vadd.f32 %v3460_v11, %v2086_v41 }
 0x477   : > { %2274 = vst.msk [vmem:[%s2837_s12 + $0x2c8] sm:$0xff] %vm2184_vm2, %v2087_v51 }
 0x478   : > { %v1542_v16 = vpop.f32.mrf.mxu3 }
 0x479   : > { %v1543_v46 = vadd.f32 %v3334_v17, %v1542_v16 }
 0x47b   : > { %v1702_v48 = vmax.f32 %v1543_v46, 0.0 }
 0x47c   : > { %v2089_v49 = vpop.f32.mrf.mxu2 }
 0x47d   : > { %v2090_v33 = vadd.f32 %v3460_v11, %v2089_v49  ;;  %1584 = vmatmul.bf16.gmra.mxu3 %v1196_v21  ;;  %v3545_v50 = vpack.c.bf16 %v1702_v48, %v1701_v45 }
 0x47f   : > { %2275 = vst.msk [vmem:[%s2837_s12 + $0x2d0] sm:$0xff] %vm2184_vm2, %v2090_v33 }
 0x480   : > { %v1545_v52 = vpop.f32.mrf.mxu3 }
 0x481   : > { %v1546_v19 = vadd.f32 %v3334_v17, %v1545_v52 }
 0x483   : > { %v1703_v55 = vmax.f32 %v1546_v19, 0.0 }
 0x484   : > { %v2091_v56 = vpop.f32.mrf.mxu2 }
 0x485   : > { %v2092_v58 = vadd.f32 %v3460_v11, %v2091_v56 }
 0x487   : > { %2276 = vst.msk [vmem:[%s2837_s12 + $0x2d8] sm:$0xff] %vm2184_vm2, %v2092_v58 }
 0x488   : > { %v1547_v30 = vpop.f32.mrf.mxu3 }
 0x489   : > { %v1548_v63 = vadd.f32 %v3334_v17, %v1547_v30 }
 0x48b   : > { %v1704_v42 = vmax.f32 %v1548_v63, 0.0 }
 0x48c   : > { %v2094_v1 = vpop.f32.mrf.mxu2 }
 0x48d   : > { %v2095_v35 = vadd.f32 %v3460_v11, %v2094_v1  ;;  %1589 = vmatmul.bf16.gmra.mxu3 %v1197_v47  ;;  %v3559_v0 = vpack.c.bf16 %v1704_v42, %v1703_v55 }
 0x48f   : > { %2277 = vst.msk [vmem:[%s2837_s12 + $0x2e0] sm:$0xff] %vm2184_vm2, %v2095_v35 }
 0x490   : > { %v1550_v26 = vpop.f32.mrf.mxu3 }
 0x491   : > { %v1551_v7 = vadd.f32 %v3334_v17, %v1550_v26 }
 0x493   : > { %v1705_v14 = vmax.f32 %v1551_v7, 0.0 }
 0x494   : > { %v2096_v2 = vpop.f32.mrf.mxu2 }
 0x495   : > { %v2097_v4 = vadd.f32 %v3460_v11, %v2096_v2 }
 0x497   : > { %2278 = vst.msk [vmem:[%s2837_s12 + $0x2e8] sm:$0xff] %vm2184_vm2, %v2097_v4 }
 0x498   : > { %v1552_v8 = vpop.f32.mrf.mxu3 }
 0x499   : > { %v1553_v13 = vadd.f32 %v3334_v17, %v1552_v8 }
 0x49b   : > { %v1706_v24 = vmax.f32 %v1553_v13, 0.0 }
 0x49c   : > { %v2099_v15 = vpop.f32.mrf.mxu2 }
 0x49d   : > { %v2100_v44 = vadd.f32 %v3460_v11, %v2099_v15  ;;  %2103 = vmatmul.bf16.vlgmr.msra.gmra.mxu3 %v3474_v22  ;;  %v1778_v18 = vpack.c.bf16 %v1706_v24, %v1705_v14 }
 0x49f   : > { %2279 = vst.msk [vmem:[%s2837_s12 + $0x2f0] sm:$0xff] %vm2184_vm2, %v2100_v44 }
 0x4a0   : > { %v1555_v37 = vpop.f32.mrf.mxu3 }
 0x4a1   : > { %v1556_v60 = vadd.f32 %v3334_v17, %v1555_v37 }
 0x4a3   : > { %v1707_v12 = vmax.f32 %v1556_v60, 0.0 }
 0x4a4   : > { %v2101_v20 = vpop.f32.mrf.mxu2 }
 0x4a5   : > { %v2102_v25 = vadd.f32 %v3460_v11, %v2101_v20 }
 0x4a7   : > { %2280 = vst.msk [vmem:[%s2837_s12 + $0x2f8] sm:$0xff] %vm2184_vm2, %v2102_v25 }
 0x4a8   : > { %v1557_v39 = vpop.f32.mrf.mxu3 }
 0x4a9   : > { %v1558_v23 = vadd.f32 %v3334_v17, %v1557_v39 }
 0x4ab   : > { %v1708_v10 = vmax.f32 %v1558_v23, 0.0 }
 0x4ad   : > { %2108 = vmatmul.bf16.gmra.mxu3 %v3489_v5  ;;  %v1779_v27 = vpack.c.bf16 %v1708_v10, %v1707_v12 }
 0x4b0   : > { %v1560_v22 = vpop.f32.mrf.mxu3 }
 0x4b1   : > { %v1561_v38 = vadd.f32 %v3334_v17, %v1560_v22 }
 0x4b3   : > { %v1709_v31 = vmax.f32 %v1561_v38, 0.0 }
 0x4b8   : > { %v1562_v29 = vpop.f32.mrf.mxu3 }
 0x4b9   : > { %v1563_v57 = vadd.f32 %v3334_v17, %v1562_v29 }
 0x4bb   : > { %v1710_v6 = vmax.f32 %v1563_v57, 0.0 }
 0x4bd   : > { %2113 = vmatmul.bf16.gmra.mxu3 %v3503_v62  ;;  %v1780_v34 = vpack.c.bf16 %v1710_v6, %v1709_v31 }
 0x4c0   : > { %v1565_v36 = vpop.f32.mrf.mxu3 }
 0x4c1   : > { %v1566_v40 = vadd.f32 %v3334_v17, %v1565_v36 }
 0x4c3   : > { %v1711_v43 = vmax.f32 %v1566_v40, 0.0 }
 0x4c8   : > { %v1567_v41 = vpop.f32.mrf.mxu3 }
 0x4c9   : > { %v1568_v51 = vadd.f32 %v3334_v17, %v1567_v41 }
 0x4cb   : > { %v1712_v5 = vmax.f32 %v1568_v51, 0.0 }
 0x4cd   : > { %2118 = vmatmul.bf16.gmra.mxu3 %v3517_v32  ;;  %v1781_v59 = vpack.c.bf16 %v1712_v5, %v1711_v43 }
 0x4d0   : > { %v1570_v28 = vpop.f32.mrf.mxu3 }
 0x4d1   : > { %v1571_v16 = vadd.f32 %v3334_v17, %v1570_v28 }
 0x4d3   : > { %v1713_v48 = vmax.f32 %v1571_v16, 0.0 }
 0x4d8   : > { %v1572_v46 = vpop.f32.mrf.mxu3 }
 0x4d9   : > { %v1573_v45 = vadd.f32 %v3334_v17, %v1572_v46 }
 0x4db   : > { %v1714_v62 = vmax.f32 %v1573_v45, 0.0 }
 0x4dd   : > { %2123 = vmatmul.bf16.gmra.mxu3 %v3531_v9  ;;  %v1782_v21 = vpack.c.bf16 %v1714_v62, %v1713_v48 }
 0x4e0   : > { %v1575_v49 = vpop.f32.mrf.mxu3 }
 0x4e1   : > { %v1576_v33 = vadd.f32 %v3334_v17, %v1575_v49 }
 0x4e3   : > { %v1715_v54 = vmax.f32 %v1576_v33, 0.0 }
 0x4e8   : > { %v1577_v52 = vpop.f32.mrf.mxu3 }
 0x4e9   : > { %v1578_v53 = vadd.f32 %v3334_v17, %v1577_v52 }
 0x4eb   : > { %v1716_v32 = vmax.f32 %v1578_v53, 0.0 }
 0x4ed   : > { %2128 = vmatmul.bf16.gmra.mxu3 %v3545_v50  ;;  %v1783_v56 = vpack.c.bf16 %v1716_v32, %v1715_v54 }
 0x4f0   : > { %v1580_v58 = vpop.f32.mrf.mxu3 }
 0x4f1   : > { %v1581_v3 = vadd.f32 %v3334_v17, %v1580_v58 }
 0x4f3   : > { %v1717_v30 = vmax.f32 %v1581_v3, 0.0 }
 0x4f8   : > { %v1582_v61 = vpop.f32.mrf.mxu3 }
 0x4f9   : > { %v1583_v19 = vadd.f32 %v3334_v17, %v1582_v61 }
 0x4fb   : > { %v1718_v9 = vmax.f32 %v1583_v19, 0.0 }
 0x4fd   : > { %2133 = vmatmul.bf16.gmra.mxu3 %v3559_v0  ;;  %v1784_v63 = vpack.c.bf16 %v1718_v9, %v1717_v30 }
 0x500   : > { %v1585_v55 = vpop.f32.mrf.mxu3 }
 0x501   : > { %v1586_v42 = vadd.f32 %v3334_v17, %v1585_v55 }
 0x503   : > { %v1719_v50 = vmax.f32 %v1586_v42, 0.0 }
 0x508   : > { %v1587_v47 = vpop.f32.mrf.mxu3 }
 0x509   : > { %v1588_v1 = vadd.f32 %v3334_v17, %v1587_v47 }
 0x50b   : > { %v1720_v35 = vmax.f32 %v1588_v1, 0.0 }
 0x50d   : > { %2138 = vmatmul.bf16.gmra.mxu3 %v1778_v18  ;;  %v1785_v26 = vpack.c.bf16 %v1720_v35, %v1719_v50 }
 0x510   : > { %v1590_v2 = vpop.f32.mrf.mxu3 }
 0x511   : > { %v1591_v4 = vadd.f32 %v3334_v17, %v1590_v2 }
 0x513   : > { %v1721_v8 = vmax.f32 %v1591_v4, 0.0 }
 0x518   : > { %v1592_v7 = vpop.f32.mrf.mxu3 }
 0x519   : > { %v1593_v0 = vadd.f32 %v3334_v17, %v1592_v7 }
 0x51b   : > { %v1722_v13 = vmax.f32 %v1593_v0, 0.0 }
 0x51d   : > { %2143 = vmatmul.bf16.gmra.mxu3 %v1779_v27  ;;  %v1786_v14 = vpack.c.bf16 %v1722_v13, %v1721_v8 }
 0x520   : > { %v2104_v24 = vpop.f32.mrf.mxu3 }
 0x521   : > { %v2105_v15 = vadd.f32 %v3460_v11, %v2104_v24 }
 0x523   : > { %2281 = vst.msk [vmem:[%s2837_s12 + $0x300] sm:$0xff] %vm2184_vm2, %v2105_v15 }
 0x528   : > { %v2106_v44 = vpop.f32.mrf.mxu3 }
 0x529   : > { %v2107_v18 = vadd.f32 %v3460_v11, %v2106_v44 }
 0x52b   : > { %2282 = vst.msk [vmem:[%s2837_s12 + $0x308] sm:$0xff] %vm2184_vm2, %v2107_v18 }
 0x52d   : > { %2148 = vmatmul.bf16.gmra.mxu3 %v1780_v34 }
 0x530   : > { %v2109_v37 = vpop.f32.mrf.mxu3 }
 0x531   : > { %v2110_v17 = vadd.f32 %v3460_v11, %v2109_v37 }
 0x533   : > { %2283 = vst.msk [vmem:[%s2837_s12 + $0x310] sm:$0xff] %vm2184_vm2, %v2110_v17 }
 0x538   : > { %v2111_v20 = vpop.f32.mrf.mxu3 }
 0x539   : > { %v2112_v25 = vadd.f32 %v3460_v11, %v2111_v20 }
 0x53b   : > { %2284 = vst.msk [vmem:[%s2837_s12 + $0x318] sm:$0xff] %vm2184_vm2, %v2112_v25 }
 0x53d   : > { %2153 = vmatmul.bf16.gmra.mxu3 %v1781_v59 }
 0x540   : > { %v2114_v60 = vpop.f32.mrf.mxu3 }
 0x541   : > { %v2115_v39 = vadd.f32 %v3460_v11, %v2114_v60 }
 0x543   : > { %2285 = vst.msk [vmem:[%s2837_s12 + $0x320] sm:$0xff] %vm2184_vm2, %v2115_v39 }
 0x548   : > { %v2116_v23 = vpop.f32.mrf.mxu3 }
 0x549   : > { %v2117_v12 = vadd.f32 %v3460_v11, %v2116_v23 }
 0x54b   : > { %2286 = vst.msk [vmem:[%s2837_s12 + $0x328] sm:$0xff] %vm2184_vm2, %v2117_v12 }
 0x54d   : > { %2158 = vmatmul.bf16.gmra.mxu3 %v1782_v21 }
 0x550   : > { %v2119_v10 = vpop.f32.mrf.mxu3 }
 0x551   : > { %v2120_v27 = vadd.f32 %v3460_v11, %v2119_v10 }
 0x553   : > { %2287 = vst.msk [vmem:[%s2837_s12 + $0x330] sm:$0xff] %vm2184_vm2, %v2120_v27 }
 0x558   : > { %v2121_v22 = vpop.f32.mrf.mxu3 }
 0x559   : > { %v2122_v38 = vadd.f32 %v3460_v11, %v2121_v22 }
 0x55b   : > { %2288 = vst.msk [vmem:[%s2837_s12 + $0x338] sm:$0xff] %vm2184_vm2, %v2122_v38 }
 0x55d   : > { %2163 = vmatmul.bf16.gmra.mxu3 %v1783_v56 }
 0x560   : > { %v2124_v29 = vpop.f32.mrf.mxu3 }
 0x561   : > { %v2125_v57 = vadd.f32 %v3460_v11, %v2124_v29 }
 0x563   : > { %2289 = vst.msk [vmem:[%s2837_s12 + $0x340] sm:$0xff] %vm2184_vm2, %v2125_v57 }
 0x568   : > { %v2126_v31 = vpop.f32.mrf.mxu3 }
 0x569   : > { %v2127_v6 = vadd.f32 %v3460_v11, %v2126_v31 }
 0x56b   : > { %2290 = vst.msk [vmem:[%s2837_s12 + $0x348] sm:$0xff] %vm2184_vm2, %v2127_v6 }
 0x56d   : > { %2168 = vmatmul.bf16.gmra.mxu3 %v1784_v63 }
 0x570   : > { %v2129_v34 = vpop.f32.mrf.mxu3 }
 0x571   : > { %v2130_v36 = vadd.f32 %v3460_v11, %v2129_v34 }
 0x573   : > { %2291 = vst.msk [vmem:[%s2837_s12 + $0x350] sm:$0xff] %vm2184_vm2, %v2130_v36 }
 0x578   : > { %v2131_v40 = vpop.f32.mrf.mxu3 }
 0x579   : > { %v2132_v41 = vadd.f32 %v3460_v11, %v2131_v40 }
 0x57b   : > { %2292 = vst.msk [vmem:[%s2837_s12 + $0x358] sm:$0xff] %vm2184_vm2, %v2132_v41 }
 0x57d   : > { %2173 = vmatmul.bf16.gmra.mxu3 %v1785_v26 }
 0x580   : > { %v2134_v51 = vpop.f32.mrf.mxu3 }
 0x581   : > { %v2135_v43 = vadd.f32 %v3460_v11, %v2134_v51 }
 0x583   : > { %2293 = vst.msk [vmem:[%s2837_s12 + $0x360] sm:$0xff] %vm2184_vm2, %v2135_v43 }
 0x588   : > { %v2136_v5 = vpop.f32.mrf.mxu3 }
 0x589   : > { %v2137_v59 = vadd.f32 %v3460_v11, %v2136_v5 }
 0x58b   : > { %2294 = vst.msk [vmem:[%s2837_s12 + $0x368] sm:$0xff] %vm2184_vm2, %v2137_v59 }
 0x58d   : > { %2178 = vmatmul.bf16.gmra.mxu3 %v1786_v14 }
 0x590   : > { %v2139_v28 = vpop.f32.mrf.mxu3 }
 0x591   : > { %v2140_v16 = vadd.f32 %v3460_v11, %v2139_v28 }
 0x593   : > { %2295 = vst.msk [vmem:[%s2837_s12 + $0x370] sm:$0xff] %vm2184_vm2, %v2140_v16 }
 0x598   : > { %v2141_v46 = vpop.f32.mrf.mxu3 }
 0x599   : > { %v2142_v45 = vadd.f32 %v3460_v11, %v2141_v46 }
 0x59b   : > { %2296 = vst.msk [vmem:[%s2837_s12 + $0x378] sm:$0xff] %vm2184_vm2, %v2142_v45 }
 0x5a0   : > { %v2144_v48 = vpop.f32.mrf.mxu3 }
 0x5a1   : > { %v2145_v62 = vadd.f32 %v3460_v11, %v2144_v48 }
 0x5a3   : > { %2297 = vst.msk [vmem:[%s2837_s12 + $0x380] sm:$0xff] %vm2184_vm2, %v2145_v62 }
 0x5a8   : > { %v2146_v21 = vpop.f32.mrf.mxu3 }
 0x5a9   : > { %v2147_v49 = vadd.f32 %v3460_v11, %v2146_v21 }
 0x5ab   : > { %2298 = vst.msk [vmem:[%s2837_s12 + $0x388] sm:$0xff] %vm2184_vm2, %v2147_v49 }
 0x5b0   : > { %v2149_v33 = vpop.f32.mrf.mxu3 }
 0x5b1   : > { %v2150_v52 = vadd.f32 %v3460_v11, %v2149_v33 }
 0x5b3   : > { %2299 = vst.msk [vmem:[%s2837_s12 + $0x390] sm:$0xff] %vm2184_vm2, %v2150_v52 }
 0x5b8   : > { %v2151_v53 = vpop.f32.mrf.mxu3 }
 0x5b9   : > { %v2152_v54 = vadd.f32 %v3460_v11, %v2151_v53 }
 0x5bb   : > { %2300 = vst.msk [vmem:[%s2837_s12 + $0x398] sm:$0xff] %vm2184_vm2, %v2152_v54 }
 0x5c0   : > { %v2154_v32 = vpop.f32.mrf.mxu3 }
 0x5c1   : > { %v2155_v56 = vadd.f32 %v3460_v11, %v2154_v32 }
 0x5c3   : > { %2301 = vst.msk [vmem:[%s2837_s12 + $0x3a0] sm:$0xff] %vm2184_vm2, %v2155_v56 }
 0x5c8   : > { %v2156_v58 = vpop.f32.mrf.mxu3 }
 0x5c9   : > { %v2157_v3 = vadd.f32 %v3460_v11, %v2156_v58 }
 0x5cb   : > { %2302 = vst.msk [vmem:[%s2837_s12 + $0x3a8] sm:$0xff] %vm2184_vm2, %v2157_v3 }
 0x5d0   : > { %v2159_v61 = vpop.f32.mrf.mxu3 }
 0x5d1   : > { %v2160_v19 = vadd.f32 %v3460_v11, %v2159_v61 }
 0x5d3   : > { %2303 = vst.msk [vmem:[%s2837_s12 + $0x3b0] sm:$0xff] %vm2184_vm2, %v2160_v19 }
 0x5d8   : > { %v2161_v30 = vpop.f32.mrf.mxu3 }
 0x5d9   : > { %v2162_v9 = vadd.f32 %v3460_v11, %v2161_v30 }
 0x5db   : > { %2304 = vst.msk [vmem:[%s2837_s12 + $0x3b8] sm:$0xff] %vm2184_vm2, %v2162_v9 }
 0x5e0   : > { %v2164_v63 = vpop.f32.mrf.mxu3 }
 0x5e1   : > { %v2165_v55 = vadd.f32 %v3460_v11, %v2164_v63 }
 0x5e3   : > { %2305 = vst.msk [vmem:[%s2837_s12 + $0x3c0] sm:$0xff] %vm2184_vm2, %v2165_v55 }
 0x5e8   : > { %v2166_v42 = vpop.f32.mrf.mxu3 }
 0x5e9   : > { %v2167_v47 = vadd.f32 %v3460_v11, %v2166_v42 }
 0x5eb   : > { %2306 = vst.msk [vmem:[%s2837_s12 + $0x3c8] sm:$0xff] %vm2184_vm2, %v2167_v47 }
 0x5f0   : > { %v2169_v1 = vpop.f32.mrf.mxu3 }
 0x5f1   : > { %v2170_v50 = vadd.f32 %v3460_v11, %v2169_v1 }
 0x5f3   : > { %2307 = vst.msk [vmem:[%s2837_s12 + $0x3d0] sm:$0xff] %vm2184_vm2, %v2170_v50 }
 0x5f8   : > { %v2171_v35 = vpop.f32.mrf.mxu3 }
 0x5f9   : > { %v2172_v26 = vadd.f32 %v3460_v11, %v2171_v35 }
 0x5fb   : > { %2308 = vst.msk [vmem:[%s2837_s12 + $0x3d8] sm:$0xff] %vm2184_vm2, %v2172_v26 }
 0x600   : > { %v2174_v2 = vpop.f32.mrf.mxu3 }
 0x601   : > { %v2175_v4 = vadd.f32 %v3460_v11, %v2174_v2 }
 0x603   : > { %2309 = vst.msk [vmem:[%s2837_s12 + $0x3e0] sm:$0xff] %vm2184_vm2, %v2175_v4 }
 0x608   : > { %v2176_v7 = vpop.f32.mrf.mxu3 }
 0x609   : > { %v2177_v0 = vadd.f32 %v3460_v11, %v2176_v7 }
 0x60b   : > { %2310 = vst.msk [vmem:[%s2837_s12 + $0x3e8] sm:$0xff] %vm2184_vm2, %v2177_v0 }
 0x610   : > { %v2179_v8 = vpop.f32.mrf.mxu3 }
 0x611   : > { %v2180_v13 = vadd.f32 %v3460_v11, %v2179_v8 }
 0x613   : > { %2311 = vst.msk [vmem:[%s2837_s12 + $0x3f0] sm:$0xff] %vm2184_vm2, %v2180_v13 }
 0x618   : > { %v2181_v14 = vpop.f32.mrf.mxu3 }
 0x619   : > { %v2182_v24 = vadd.f32 %v3460_v11, %v2181_v14 }
 0x61b   : > { %2312 = vst.msk [vmem:[%s2837_s12 + $0x3f8] sm:$0xff] %vm2184_vm2, %v2182_v24 }
 0x61c PF: > { %s17_s24 = sadd.s32 1, %s2572_s24  }
 0x61d   : > { %p14_p4 = scmp.ge.s32.totalorder %s17_s24, 4  }
 0x61f   :  { %16 = sbr.rel (!%p14_p4) target bundleno = 1 (0x1), region = 78 }

</bundles_post_ra>
